<compile_context>
chip_gen: v7x
topology: tpu7x:2x2x1
jax: 0.10.0
libtpu: 0.0.40
codegen_flags: <defaults>
</compile_context>

<pallas_src>
import functools

import jax
import jax.numpy as jnp
from jax.experimental import pallas as pl
from jax.experimental.pallas import tpu as pltpu

# ---- scaled-down DistilBERT config (original: vocab=30522, hidden=768, 12 heads, 6 layers) ----
VOCAB = 128          # lane-dense one-hot embedding matmul (B*S, V) @ (V, H)
MAX_POS = 16
HIDDEN = 128
N_HEADS = 2
HEAD_DIM = HIDDEN // N_HEADS
FFN = 256
N_LAYERS = 2
EPS = 1e-12
NEG_INF = -1e9


# --------------------------- in-kernel helpers (pure value functions) ---------------------------

def _layernorm(x, g, b):
    # f32 elementwise path on all generations.
    mu = jnp.mean(x, axis=-1, keepdims=True)
    var = jnp.mean(jnp.square(x - mu), axis=-1, keepdims=True)
    return (x - mu) * jax.lax.rsqrt(var + EPS) * g + b


def _gelu(y):
    # TODO(synk): HF DistilBERT uses exact erf-GELU; tanh approximation used here.
    return 0.5 * y * (1.0 + jnp.tanh(0.7978845608028654 * (y + 0.044715 * y * y * y)))


# --------------------------- fused whole-forward Pallas kernel ---------------------------

def _fused_forward_kernel(
    ids_ref, mask_ref,
    word_emb_ref, pos_emb_ref, emb_ln_g_ref, emb_ln_b_ref,
    qkv_w_ref, qkv_b_ref, o_w_ref, o_b_ref,
    sa_ln_g_ref, sa_ln_b_ref,
    ff1_w_ref, ff1_b_ref, ff2_w_ref, ff2_b_ref,
    out_ln_g_ref, out_ln_b_ref,
    fc_w_ref, fc_b_ref,
    logits_ref,
    *, batch, seq, n_heads, head_dim, n_layers, vocab):
    hidden = n_heads * head_dim
    rows = batch * seq
    scale = 1.0 / float(head_dim) ** 0.5
    mask = mask_ref[...]                                      # (B*nh, S, S) additive key mask

    # ---- embeddings fused in-kernel: one-hot MXU matmul + position add ----
    ids = ids_ref[...]                                        # (B*S, 1) int32
    col = jax.lax.broadcasted_iota(jnp.int32, (rows, vocab), 1)
    onehot = (col == ids).astype(jnp.bfloat16)                # (B*S, V), exact in bf16
    h = jnp.dot(onehot, word_emb_ref[...], preferred_element_type=jnp.float32)   # (B*S, H)
    pos = pos_emb_ref[0:seq, :]                               # (S, H) f32
    h = h + jnp.concatenate([pos] * batch, axis=0)
    # DistilBERT embedding LayerNorm (nn.Dropout == identity in eval mode)
    h = _layernorm(h, emb_ln_g_ref[...], emb_ln_b_ref[...])   # (B*S, H) f32

    for l in range(n_layers):
        x = h
        # fused Q/K/V projection: one (B*S, H) @ (H, 3H) bf16 MXU pass, f32 accumulation
        qkv = jnp.dot(x.astype(jnp.bfloat16), qkv_w_ref[l],
                      preferred_element_type=jnp.float32) + qkv_b_ref[l]          # (B*S, 3H)

        # ---- attention: all B*n_heads pairs merged into two batched dot_generals ----
        q_l, k_l, v_l = [], [], []
        for b in range(batch):
            r0 = b * seq
            for hd in range(n_heads):
                c0 = hd * head_dim
                q_l.append(qkv[r0:r0 + seq, c0:c0 + head_dim])
                k_l.append(qkv[r0:r0 + seq, hidden + c0:hidden + c0 + head_dim])
                v_l.append(qkv[r0:r0 + seq, 2 * hidden + c0:2 * hidden + c0 + head_dim])
        q = jnp.stack(q_l).astype(jnp.bfloat16)               # (B*nh, S, Dh)
        k = jnp.stack(k_l).astype(jnp.bfloat16)
        v = jnp.stack(v_l).astype(jnp.bfloat16)

        s = jnp.einsum('gqd,gkd->gqk', q, k,
                       preferred_element_type=jnp.float32) * scale + mask          # (B*nh, S, S)
        s = s - jnp.max(s, axis=-1, keepdims=True)
        p = jnp.exp(s)                                        # f32 softmax (EUP exp)
        p = p * pl.reciprocal(jnp.sum(p, axis=-1, keepdims=True), approx=True)
        ctx_g = jnp.einsum('gqk,gkd->gqd', p.astype(jnp.bfloat16), v,
                           preferred_element_type=jnp.float32)                     # (B*nh, S, Dh)

        # reassemble lane-dense (B*S, H) context as a VALUE: heads side-by-side along
        # the 128 lanes, batches stacked along rows (no scratch, no masked stores)
        ctx = jnp.concatenate(
            [jnp.concatenate([ctx_g[b * n_heads + hd] for hd in range(n_heads)], axis=-1)
             for b in range(batch)], axis=0)                                       # (B*S, H)

        attn_out = jnp.dot(ctx.astype(jnp.bfloat16), o_w_ref[l],
                           preferred_element_type=jnp.float32) + o_b_ref[l]
        h = _layernorm(x + attn_out, sa_ln_g_ref[l], sa_ln_b_ref[l])               # sa_layer_norm

        ff = jnp.dot(h.astype(jnp.bfloat16), ff1_w_ref[l],
                     preferred_element_type=jnp.float32) + ff1_b_ref[l]
        ff = _gelu(ff)
        ff = jnp.dot(ff.astype(jnp.bfloat16), ff2_w_ref[l],
                     preferred_element_type=jnp.float32) + ff2_b_ref[l]
        h = _layernorm(h + ff, out_ln_g_ref[l], out_ln_b_ref[l])                   # output_layer_norm

    # CLS pooling (outputs[0][:, 0, :]) + classifier head; dropout(pooled) == identity
    # in eval mode.  One (B, H) gather, one cross-lane reduce, one (B, 1) store.
    cls = jnp.concatenate([h[b * seq:b * seq + 1, :] for b in range(batch)], axis=0)  # (B, H)
    logits_ref[...] = jnp.sum(cls * fc_w_ref[...], axis=-1, keepdims=True) + fc_b_ref[...]


# --------------------------- parameters ---------------------------

def init_params(key):
    # TODO(synk): original module loads pretrained 'distilbert-base-uncased' weights;
    # synthetic deterministic init here (std=0.02 normal). Matmul weights stored bf16.
    def nrm(k, shape, std=0.02, dtype=jnp.float32):
        return (std * jax.random.normal(k, shape, dtype=jnp.float32)).astype(dtype)

    keys = iter(jax.random.split(key, 3 + 4 * N_LAYERS))
    params = {
        "word_emb": nrm(next(keys), (VOCAB, HIDDEN), dtype=jnp.bfloat16),
        "pos_emb": nrm(next(keys), (MAX_POS, HIDDEN)),
        "emb_ln_g": jnp.ones((1, HIDDEN), jnp.float32),
        "emb_ln_b": jnp.zeros((1, HIDDEN), jnp.float32),
        # classifier head stored pre-transposed (1, H) for the in-kernel VPU reduce
        "fc_w_t": nrm(next(keys), (1, HIDDEN)),
        "fc_b": jnp.zeros((1, 1), jnp.float32),
    }
    qkv_w, o_w, ff1_w, ff2_w = [], [], [], []
    for _ in range(N_LAYERS):
        # Q/K/V weights fused along the output dim -> one (H, 3H) matmul per layer;
        # columns ordered [Q(head0,head1) | K(head0,head1) | V(head0,head1)]
        qkv_w.append(nrm(next(keys), (HIDDEN, 3 * HIDDEN), dtype=jnp.bfloat16))
        o_w.append(nrm(next(keys), (HIDDEN, HIDDEN), dtype=jnp.bfloat16))
        ff1_w.append(nrm(next(keys), (HIDDEN, FFN), dtype=jnp.bfloat16))
        ff2_w.append(nrm(next(keys), (FFN, HIDDEN), dtype=jnp.bfloat16))
    params.update({
        "qkv_w": jnp.stack(qkv_w),                                   # (L, H, 3H) bf16
        "qkv_b": jnp.zeros((N_LAYERS, 1, 3 * HIDDEN), jnp.float32),
        "o_w": jnp.stack(o_w),                                       # (L, H, H) bf16
        "o_b": jnp.zeros((N_LAYERS, 1, HIDDEN), jnp.float32),
        "sa_ln_g": jnp.ones((N_LAYERS, 1, HIDDEN), jnp.float32),
        "sa_ln_b": jnp.zeros((N_LAYERS, 1, HIDDEN), jnp.float32),
        "ff1_w": jnp.stack(ff1_w),                                   # (L, H, FFN) bf16
        "ff1_b": jnp.zeros((N_LAYERS, 1, FFN), jnp.float32),
        "ff2_w": jnp.stack(ff2_w),                                   # (L, FFN, H) bf16
        "ff2_b": jnp.zeros((N_LAYERS, 1, HIDDEN), jnp.float32),
        "out_ln_g": jnp.ones((N_LAYERS, 1, HIDDEN), jnp.float32),
        "out_ln_b": jnp.zeros((N_LAYERS, 1, HIDDEN), jnp.float32),
    })
    return params


# --------------------------- forward pass ---------------------------

def sentiment_forward(params, input_ids, attention_mask):
    B, S = input_ids.shape
    ids = input_ids.reshape(B * S, 1).astype(jnp.int32)

    # additive attention mask over keys, pre-broadcast to the (B*n_heads, S, S) score shape
    mask_add = (1.0 - attention_mask.astype(jnp.float32)) * NEG_INF            # (B, S)
    mask_g = jnp.broadcast_to(mask_add[:, None, None, :],
                              (B, N_HEADS, S, S)).reshape(B * N_HEADS, S, S)

    kernel = functools.partial(
        _fused_forward_kernel, batch=B, seq=S, n_heads=N_HEADS,
        head_dim=HEAD_DIM, n_layers=N_LAYERS, vocab=VOCAB)

    # Single fused pallas_call: no grid, all weights/activations whole-array in VMEM
    # (~0.6 MB bf16 weights, <0.2 MB activations).  vmem_limit_bytes only matters for
    # the scaled-up config; harmless headroom here.
    return pl.pallas_call(
        kernel,
        out_shape=jax.ShapeDtypeStruct((B, 1), jnp.float32),
        compiler_params=pltpu.CompilerParams(vmem_limit_bytes=32 * 1024 * 1024),
    )(ids, mask_g,
      params["word_emb"], params["pos_emb"],
      params["emb_ln_g"], params["emb_ln_b"],
      params["qkv_w"], params["qkv_b"], params["o_w"], params["o_b"],
      params["sa_ln_g"], params["sa_ln_b"],
      params["ff1_w"], params["ff1_b"], params["ff2_w"], params["ff2_b"],
      params["out_ln_g"], params["out_ln_b"],
      params["fc_w_t"], params["fc_b"])


# --------------------------- main ---------------------------

if __name__ == "__main__":
    key = jax.random.PRNGKey(0)
    pkey, dkey = jax.random.split(key)
    params = init_params(pkey)

    B, S = 2, 8   # S <= MAX_POS, multiple of 8 sublanes
    input_ids = jax.random.randint(dkey, (B, S), 0, VOCAB, dtype=jnp.int32)
    attention_mask = jnp.ones((B, S), dtype=jnp.int32)
    attention_mask = attention_mask.at[1, 6:].set(0)   # pad tail of second example

    logits = jax.jit(sentiment_forward)(params, input_ids, attention_mask)
    logits = jax.block_until_ready(logits)
    assert logits.shape == (B, 1) and logits.dtype == jnp.float32
    print("KERNEL_OK")
</pallas_src>

<mosaic_0001>
module attributes {stable_mosaic.version = 11 : i64} {
  func.func @_fused_forward_kernel(%arg0: memref<16x1xi32, #tpu.memory_space<vmem>>, %arg1: memref<4x8x8xf32, #tpu.memory_space<vmem>>, %arg2: memref<128x128xbf16, #tpu.memory_space<vmem>>, %arg3: memref<16x128xf32, #tpu.memory_space<vmem>>, %arg4: memref<1x128xf32, #tpu.memory_space<vmem>>, %arg5: memref<1x128xf32, #tpu.memory_space<vmem>>, %arg6: memref<2x128x384xbf16, #tpu.memory_space<vmem>>, %arg7: memref<2x1x384xf32, #tpu.memory_space<vmem>>, %arg8: memref<2x128x128xbf16, #tpu.memory_space<vmem>>, %arg9: memref<2x1x128xf32, #tpu.memory_space<vmem>>, %arg10: memref<2x1x128xf32, #tpu.memory_space<vmem>>, %arg11: memref<2x1x128xf32, #tpu.memory_space<vmem>>, %arg12: memref<2x128x256xbf16, #tpu.memory_space<vmem>>, %arg13: memref<2x1x256xf32, #tpu.memory_space<vmem>>, %arg14: memref<2x256x128xbf16, #tpu.memory_space<vmem>>, %arg15: memref<2x1x128xf32, #tpu.memory_space<vmem>>, %arg16: memref<2x1x128xf32, #tpu.memory_space<vmem>>, %arg17: memref<2x1x128xf32, #tpu.memory_space<vmem>>, %arg18: memref<1x128xf32, #tpu.memory_space<vmem>>, %arg19: memref<1x1xf32, #tpu.memory_space<vmem>>, %arg20: memref<2x1xf32, #tpu.memory_space<vmem>>) attributes {dimension_semantics = [], scalar_prefetch = 0 : i64, scratch_operands = 0 : i64, tpu.core_type = #tpu.core_type<tc>} {
    %c0 = arith.constant 0 : index
    %c0_0 = arith.constant 0 : index
    %c0_1 = arith.constant 0 : index
    %0 = vector.load %arg1[%c0, %c0_0, %c0_1] : memref<4x8x8xf32, #tpu.memory_space<vmem>>, vector<4x8x8xf32>
    %c0_2 = arith.constant 0 : index
    %c0_3 = arith.constant 0 : index
    %1 = vector.load %arg0[%c0_2, %c0_3] : memref<16x1xi32, #tpu.memory_space<vmem>>, vector<16x1xi32>
    %2 = tpu.iota {dimensions = array<i32: 1>} : vector<16x128xi32>
    %3 = vector.broadcast %1 : vector<16x1xi32> to vector<16x128xi32>
    %4 = arith.cmpi eq, %2, %3 : vector<16x128xi32>
    %5 = arith.extui %4 : vector<16x128xi1> to vector<16x128xi32>
    %6 = arith.sitofp %5 : vector<16x128xi32> to vector<16x128xf32>
    %7 = arith.truncf %6 : vector<16x128xf32> to vector<16x128xbf16>
    %c0_4 = arith.constant 0 : index
    %c0_5 = arith.constant 0 : index
    %8 = vector.load %arg2[%c0_4, %c0_5] : memref<128x128xbf16, #tpu.memory_space<vmem>>, vector<128x128xbf16>
    %cst = arith.constant dense<0.000000e+00> : vector<16x128xf32>
    %9 = tpu.matmul %7, %8, %cst {dimension_numbers = #tpu.dot_dimension_numbers<[1], [0], [0], [1], [0, 0, 1, 1], [], []>} : vector<16x128xbf16>, vector<128x128xbf16>, vector<16x128xf32> -> vector<16x128xf32>
    %c0_6 = arith.constant 0 : index
    %c0_7 = arith.constant 0 : index
    %10 = vector.load %arg3[%c0_6, %c0_7] : memref<16x128xf32, #tpu.memory_space<vmem>>, vector<8x128xf32>
    %11 = tpu.concatenate %10, %10 in 0 : vector<8x128xf32>, vector<8x128xf32> -> vector<16x128xf32>
    %12 = arith.addf %9, %11 : vector<16x128xf32>
    %c0_8 = arith.constant 0 : index
    %c0_9 = arith.constant 0 : index
    %13 = vector.load %arg4[%c0_8, %c0_9] : memref<1x128xf32, #tpu.memory_space<vmem>>, vector<1x128xf32>
    %c0_10 = arith.constant 0 : index
    %c0_11 = arith.constant 0 : index
    %14 = vector.load %arg5[%c0_10, %c0_11] : memref<1x128xf32, #tpu.memory_space<vmem>>, vector<1x128xf32>
    %cst_12 = arith.constant dense<0.000000e+00> : vector<16xf32>
    %15 = vector.multi_reduction <add>, %12, %cst_12 [1] : vector<16x128xf32> to vector<16xf32>
    %16 = vector.shape_cast %15 : vector<16xf32> to vector<16x1xf32>
    %cst_13 = arith.constant 1.280000e+02 : f32
    %17 = vector.broadcast %cst_13 : f32 to vector<16x1xf32>
    %18 = arith.divf %16, %17 : vector<16x1xf32>
    %19 = vector.broadcast %18 : vector<16x1xf32> to vector<16x128xf32>
    %20 = arith.subf %12, %19 : vector<16x128xf32>
    %21 = arith.mulf %20, %20 : vector<16x128xf32>
    %cst_14 = arith.constant dense<0.000000e+00> : vector<16xf32>
    %22 = vector.multi_reduction <add>, %21, %cst_14 [1] : vector<16x128xf32> to vector<16xf32>
    %23 = vector.shape_cast %22 : vector<16xf32> to vector<16x1xf32>
    %cst_15 = arith.constant 1.280000e+02 : f32
    %24 = vector.broadcast %cst_15 : f32 to vector<16x1xf32>
    %25 = arith.divf %23, %24 : vector<16x1xf32>
    %26 = vector.broadcast %18 : vector<16x1xf32> to vector<16x128xf32>
    %27 = arith.subf %12, %26 : vector<16x128xf32>
    %cst_16 = arith.constant 9.99999996E-13 : f32
    %28 = vector.broadcast %cst_16 : f32 to vector<16x1xf32>
    %29 = arith.addf %25, %28 : vector<16x1xf32>
    %30 = math.rsqrt %29 : vector<16x1xf32>
    %31 = vector.broadcast %30 : vector<16x1xf32> to vector<16x128xf32>
    %32 = arith.mulf %27, %31 : vector<16x128xf32>
    %33 = vector.broadcast %13 : vector<1x128xf32> to vector<16x128xf32>
    %34 = arith.mulf %32, %33 : vector<16x128xf32>
    %35 = vector.broadcast %14 : vector<1x128xf32> to vector<16x128xf32>
    %36 = arith.addf %34, %35 : vector<16x128xf32>
    %37 = arith.truncf %36 : vector<16x128xf32> to vector<16x128xbf16>
    %c0_17 = arith.constant 0 : index
    %c0_18 = arith.constant 0 : index
    %c0_19 = arith.constant 0 : index
    %38 = vector.load %arg6[%c0_17, %c0_18, %c0_19] : memref<2x128x384xbf16, #tpu.memory_space<vmem>>, vector<1x128x384xbf16>
    %39 = vector.shape_cast %38 : vector<1x128x384xbf16> to vector<128x384xbf16>
    %cst_20 = arith.constant dense<0.000000e+00> : vector<16x384xf32>
    %40 = tpu.matmul %37, %39, %cst_20 {dimension_numbers = #tpu.dot_dimension_numbers<[1], [0], [0], [1], [0, 0, 1, 1], [], []>} : vector<16x128xbf16>, vector<128x384xbf16>, vector<16x384xf32> -> vector<16x384xf32>
    %c0_21 = arith.constant 0 : index
    %c0_22 = arith.constant 0 : index
    %c0_23 = arith.constant 0 : index
    %41 = vector.load %arg7[%c0_21, %c0_22, %c0_23] : memref<2x1x384xf32, #tpu.memory_space<vmem>>, vector<1x1x384xf32>
    %42 = vector.shape_cast %41 : vector<1x1x384xf32> to vector<1x384xf32>
    %43 = vector.broadcast %42 : vector<1x384xf32> to vector<16x384xf32>
    %44 = arith.addf %40, %43 : vector<16x384xf32>
    %45 = vector.extract_strided_slice %44 {offsets = [0, 0], sizes = [8, 64], strides = [1, 1]} : vector<16x384xf32> to vector<8x64xf32>
    %46 = vector.extract_strided_slice %44 {offsets = [0, 128], sizes = [8, 64], strides = [1, 1]} : vector<16x384xf32> to vector<8x64xf32>
    %47 = vector.extract_strided_slice %44 {offsets = [0, 256], sizes = [8, 64], strides = [1, 1]} : vector<16x384xf32> to vector<8x64xf32>
    %48 = vector.extract_strided_slice %44 {offsets = [0, 64], sizes = [8, 64], strides = [1, 1]} : vector<16x384xf32> to vector<8x64xf32>
    %49 = vector.extract_strided_slice %44 {offsets = [0, 192], sizes = [8, 64], strides = [1, 1]} : vector<16x384xf32> to vector<8x64xf32>
    %50 = vector.extract_strided_slice %44 {offsets = [0, 320], sizes = [8, 64], strides = [1, 1]} : vector<16x384xf32> to vector<8x64xf32>
    %51 = vector.extract_strided_slice %44 {offsets = [8, 0], sizes = [8, 64], strides = [1, 1]} : vector<16x384xf32> to vector<8x64xf32>
    %52 = vector.extract_strided_slice %44 {offsets = [8, 128], sizes = [8, 64], strides = [1, 1]} : vector<16x384xf32> to vector<8x64xf32>
    %53 = vector.extract_strided_slice %44 {offsets = [8, 256], sizes = [8, 64], strides = [1, 1]} : vector<16x384xf32> to vector<8x64xf32>
    %54 = vector.extract_strided_slice %44 {offsets = [8, 64], sizes = [8, 64], strides = [1, 1]} : vector<16x384xf32> to vector<8x64xf32>
    %55 = vector.extract_strided_slice %44 {offsets = [8, 192], sizes = [8, 64], strides = [1, 1]} : vector<16x384xf32> to vector<8x64xf32>
    %56 = vector.extract_strided_slice %44 {offsets = [8, 320], sizes = [8, 64], strides = [1, 1]} : vector<16x384xf32> to vector<8x64xf32>
    %57 = vector.shape_cast %45 : vector<8x64xf32> to vector<1x8x64xf32>
    %58 = vector.shape_cast %48 : vector<8x64xf32> to vector<1x8x64xf32>
    %59 = vector.shape_cast %51 : vector<8x64xf32> to vector<1x8x64xf32>
    %60 = vector.shape_cast %54 : vector<8x64xf32> to vector<1x8x64xf32>
    %61 = tpu.concatenate %57, %58, %59, %60 in 0 : vector<1x8x64xf32>, vector<1x8x64xf32>, vector<1x8x64xf32>, vector<1x8x64xf32> -> vector<4x8x64xf32>
    %62 = arith.truncf %61 : vector<4x8x64xf32> to vector<4x8x64xbf16>
    %63 = vector.shape_cast %46 : vector<8x64xf32> to vector<1x8x64xf32>
    %64 = vector.shape_cast %49 : vector<8x64xf32> to vector<1x8x64xf32>
    %65 = vector.shape_cast %52 : vector<8x64xf32> to vector<1x8x64xf32>
    %66 = vector.shape_cast %55 : vector<8x64xf32> to vector<1x8x64xf32>
    %67 = tpu.concatenate %63, %64, %65, %66 in 0 : vector<1x8x64xf32>, vector<1x8x64xf32>, vector<1x8x64xf32>, vector<1x8x64xf32> -> vector<4x8x64xf32>
    %68 = arith.truncf %67 : vector<4x8x64xf32> to vector<4x8x64xbf16>
    %69 = vector.shape_cast %47 : vector<8x64xf32> to vector<1x8x64xf32>
    %70 = vector.shape_cast %50 : vector<8x64xf32> to vector<1x8x64xf32>
    %71 = vector.shape_cast %53 : vector<8x64xf32> to vector<1x8x64xf32>
    %72 = vector.shape_cast %56 : vector<8x64xf32> to vector<1x8x64xf32>
    %73 = tpu.concatenate %69, %70, %71, %72 in 0 : vector<1x8x64xf32>, vector<1x8x64xf32>, vector<1x8x64xf32>, vector<1x8x64xf32> -> vector<4x8x64xf32>
    %74 = arith.truncf %73 : vector<4x8x64xf32> to vector<4x8x64xbf16>
    "tpu.trace_start"() <{level = 10 : i32, message = "gqd,gkd->gqk"}> : () -> ()
    %cst_24 = arith.constant dense<0.000000e+00> : vector<4x8x8xf32>
    %75 = tpu.matmul %62, %68, %cst_24 {dimension_numbers = #tpu.dot_dimension_numbers<[2], [2], [1], [1], [0, 0, 0, 1, 1, 1], [0], [0]>} : vector<4x8x64xbf16>, vector<4x8x64xbf16>, vector<4x8x8xf32> -> vector<4x8x8xf32>
    "tpu.trace_stop"() : () -> ()
    %cst_25 = arith.constant 1.250000e-01 : f32
    %76 = vector.broadcast %cst_25 : f32 to vector<4x8x8xf32>
    %77 = arith.mulf %75, %76 : vector<4x8x8xf32>
    %78 = arith.addf %77, %0 : vector<4x8x8xf32>
    %cst_26 = arith.constant dense<0xFF800000> : vector<4x8xf32>
    %79 = vector.multi_reduction <maximumf>, %78, %cst_26 [2] : vector<4x8x8xf32> to vector<4x8xf32>
    %80 = vector.shape_cast %79 : vector<4x8xf32> to vector<4x8x1xf32>
    %81 = vector.broadcast %80 : vector<4x8x1xf32> to vector<4x8x8xf32>
    %82 = arith.subf %78, %81 : vector<4x8x8xf32>
    %83 = math.exp %82 : vector<4x8x8xf32>
    %cst_27 = arith.constant dense<0.000000e+00> : vector<4x8xf32>
    %84 = vector.multi_reduction <add>, %83, %cst_27 [2] : vector<4x8x8xf32> to vector<4x8xf32>
    %85 = vector.shape_cast %84 : vector<4x8xf32> to vector<4x8x1xf32>
    %86 = tpu.reciprocal %85 {approx = true} : vector<4x8x1xf32> -> vector<4x8x1xf32>
    %87 = vector.broadcast %86 : vector<4x8x1xf32> to vector<4x8x8xf32>
    %88 = arith.mulf %83, %87 : vector<4x8x8xf32>
    %89 = arith.truncf %88 : vector<4x8x8xf32> to vector<4x8x8xbf16>
    "tpu.trace_start"() <{level = 10 : i32, message = "gqk,gkd->gqd"}> : () -> ()
    %cst_28 = arith.constant dense<0.000000e+00> : vector<4x8x64xf32>
    %90 = tpu.matmul %89, %74, %cst_28 {dimension_numbers = #tpu.dot_dimension_numbers<[2], [1], [1], [2], [0, 0, 0, 1, 1, 2], [0], [0]>} : vector<4x8x8xbf16>, vector<4x8x64xbf16>, vector<4x8x64xf32> -> vector<4x8x64xf32>
    "tpu.trace_stop"() : () -> ()
    %91 = vector.extract_strided_slice %90 {offsets = [0, 0, 0], sizes = [1, 8, 64], strides = [1, 1, 1]} : vector<4x8x64xf32> to vector<1x8x64xf32>
    %92 = vector.shape_cast %91 : vector<1x8x64xf32> to vector<8x64xf32>
    %93 = vector.extract_strided_slice %90 {offsets = [1, 0, 0], sizes = [1, 8, 64], strides = [1, 1, 1]} : vector<4x8x64xf32> to vector<1x8x64xf32>
    %94 = vector.shape_cast %93 : vector<1x8x64xf32> to vector<8x64xf32>
    %95 = tpu.concatenate %92, %94 in 1 : vector<8x64xf32>, vector<8x64xf32> -> vector<8x128xf32>
    %96 = vector.extract_strided_slice %90 {offsets = [2, 0, 0], sizes = [1, 8, 64], strides = [1, 1, 1]} : vector<4x8x64xf32> to vector<1x8x64xf32>
    %97 = vector.shape_cast %96 : vector<1x8x64xf32> to vector<8x64xf32>
    %98 = vector.extract_strided_slice %90 {offsets = [3, 0, 0], sizes = [1, 8, 64], strides = [1, 1, 1]} : vector<4x8x64xf32> to vector<1x8x64xf32>
    %99 = vector.shape_cast %98 : vector<1x8x64xf32> to vector<8x64xf32>
    %100 = tpu.concatenate %97, %99 in 1 : vector<8x64xf32>, vector<8x64xf32> -> vector<8x128xf32>
    %101 = tpu.concatenate %95, %100 in 0 : vector<8x128xf32>, vector<8x128xf32> -> vector<16x128xf32>
    %102 = arith.truncf %101 : vector<16x128xf32> to vector<16x128xbf16>
    %c0_29 = arith.constant 0 : index
    %c0_30 = arith.constant 0 : index
    %c0_31 = arith.constant 0 : index
    %103 = vector.load %arg8[%c0_29, %c0_30, %c0_31] : memref<2x128x128xbf16, #tpu.memory_space<vmem>>, vector<1x128x128xbf16>
    %104 = vector.shape_cast %103 : vector<1x128x128xbf16> to vector<128x128xbf16>
    %cst_32 = arith.constant dense<0.000000e+00> : vector<16x128xf32>
    %105 = tpu.matmul %102, %104, %cst_32 {dimension_numbers = #tpu.dot_dimension_numbers<[1], [0], [0], [1], [0, 0, 1, 1], [], []>} : vector<16x128xbf16>, vector<128x128xbf16>, vector<16x128xf32> -> vector<16x128xf32>
    %c0_33 = arith.constant 0 : index
    %c0_34 = arith.constant 0 : index
    %c0_35 = arith.constant 0 : index
    %106 = vector.load %arg9[%c0_33, %c0_34, %c0_35] : memref<2x1x128xf32, #tpu.memory_space<vmem>>, vector<1x1x128xf32>
    %107 = vector.shape_cast %106 : vector<1x1x128xf32> to vector<1x128xf32>
    %108 = vector.broadcast %107 : vector<1x128xf32> to vector<16x128xf32>
    %109 = arith.addf %105, %108 : vector<16x128xf32>
    %110 = arith.addf %36, %109 : vector<16x128xf32>
    %c0_36 = arith.constant 0 : index
    %c0_37 = arith.constant 0 : index
    %c0_38 = arith.constant 0 : index
    %111 = vector.load %arg10[%c0_36, %c0_37, %c0_38] : memref<2x1x128xf32, #tpu.memory_space<vmem>>, vector<1x1x128xf32>
    %112 = vector.shape_cast %111 : vector<1x1x128xf32> to vector<1x128xf32>
    %c0_39 = arith.constant 0 : index
    %c0_40 = arith.constant 0 : index
    %c0_41 = arith.constant 0 : index
    %113 = vector.load %arg11[%c0_39, %c0_40, %c0_41] : memref<2x1x128xf32, #tpu.memory_space<vmem>>, vector<1x1x128xf32>
    %114 = vector.shape_cast %113 : vector<1x1x128xf32> to vector<1x128xf32>
    %cst_42 = arith.constant dense<0.000000e+00> : vector<16xf32>
    %115 = vector.multi_reduction <add>, %110, %cst_42 [1] : vector<16x128xf32> to vector<16xf32>
    %116 = vector.shape_cast %115 : vector<16xf32> to vector<16x1xf32>
    %cst_43 = arith.constant 1.280000e+02 : f32
    %117 = vector.broadcast %cst_43 : f32 to vector<16x1xf32>
    %118 = arith.divf %116, %117 : vector<16x1xf32>
    %119 = vector.broadcast %118 : vector<16x1xf32> to vector<16x128xf32>
    %120 = arith.subf %110, %119 : vector<16x128xf32>
    %121 = arith.mulf %120, %120 : vector<16x128xf32>
    %cst_44 = arith.constant dense<0.000000e+00> : vector<16xf32>
    %122 = vector.multi_reduction <add>, %121, %cst_44 [1] : vector<16x128xf32> to vector<16xf32>
    %123 = vector.shape_cast %122 : vector<16xf32> to vector<16x1xf32>
    %cst_45 = arith.constant 1.280000e+02 : f32
    %124 = vector.broadcast %cst_45 : f32 to vector<16x1xf32>
    %125 = arith.divf %123, %124 : vector<16x1xf32>
    %126 = vector.broadcast %118 : vector<16x1xf32> to vector<16x128xf32>
    %127 = arith.subf %110, %126 : vector<16x128xf32>
    %cst_46 = arith.constant 9.99999996E-13 : f32
    %128 = vector.broadcast %cst_46 : f32 to vector<16x1xf32>
    %129 = arith.addf %125, %128 : vector<16x1xf32>
    %130 = math.rsqrt %129 : vector<16x1xf32>
    %131 = vector.broadcast %130 : vector<16x1xf32> to vector<16x128xf32>
    %132 = arith.mulf %127, %131 : vector<16x128xf32>
    %133 = vector.broadcast %112 : vector<1x128xf32> to vector<16x128xf32>
    %134 = arith.mulf %132, %133 : vector<16x128xf32>
    %135 = vector.broadcast %114 : vector<1x128xf32> to vector<16x128xf32>
    %136 = arith.addf %134, %135 : vector<16x128xf32>
    %137 = arith.truncf %136 : vector<16x128xf32> to vector<16x128xbf16>
    %c0_47 = arith.constant 0 : index
    %c0_48 = arith.constant 0 : index
    %c0_49 = arith.constant 0 : index
    %138 = vector.load %arg12[%c0_47, %c0_48, %c0_49] : memref<2x128x256xbf16, #tpu.memory_space<vmem>>, vector<1x128x256xbf16>
    %139 = vector.shape_cast %138 : vector<1x128x256xbf16> to vector<128x256xbf16>
    %cst_50 = arith.constant dense<0.000000e+00> : vector<16x256xf32>
    %140 = tpu.matmul %137, %139, %cst_50 {dimension_numbers = #tpu.dot_dimension_numbers<[1], [0], [0], [1], [0, 0, 1, 1], [], []>} : vector<16x128xbf16>, vector<128x256xbf16>, vector<16x256xf32> -> vector<16x256xf32>
    %c0_51 = arith.constant 0 : index
    %c0_52 = arith.constant 0 : index
    %c0_53 = arith.constant 0 : index
    %141 = vector.load %arg13[%c0_51, %c0_52, %c0_53] : memref<2x1x256xf32, #tpu.memory_space<vmem>>, vector<1x1x256xf32>
    %142 = vector.shape_cast %141 : vector<1x1x256xf32> to vector<1x256xf32>
    %143 = vector.broadcast %142 : vector<1x256xf32> to vector<16x256xf32>
    %144 = arith.addf %140, %143 : vector<16x256xf32>
    %cst_54 = arith.constant 5.000000e-01 : f32
    %145 = vector.broadcast %cst_54 : f32 to vector<16x256xf32>
    %146 = arith.mulf %145, %144 : vector<16x256xf32>
    %cst_55 = arith.constant 4.471500e-02 : f32
    %147 = vector.broadcast %cst_55 : f32 to vector<16x256xf32>
    %148 = arith.mulf %147, %144 : vector<16x256xf32>
    %149 = arith.mulf %148, %144 : vector<16x256xf32>
    %150 = arith.mulf %149, %144 : vector<16x256xf32>
    %151 = arith.addf %144, %150 : vector<16x256xf32>
    %cst_56 = arith.constant 0.797884583 : f32
    %152 = vector.broadcast %cst_56 : f32 to vector<16x256xf32>
    %153 = arith.mulf %152, %151 : vector<16x256xf32>
    %154 = math.tanh %153 : vector<16x256xf32>
    %cst_57 = arith.constant 1.000000e+00 : f32
    %155 = vector.broadcast %cst_57 : f32 to vector<16x256xf32>
    %156 = arith.addf %155, %154 : vector<16x256xf32>
    %157 = arith.mulf %146, %156 : vector<16x256xf32>
    %158 = arith.truncf %157 : vector<16x256xf32> to vector<16x256xbf16>
    %c0_58 = arith.constant 0 : index
    %c0_59 = arith.constant 0 : index
    %c0_60 = arith.constant 0 : index
    %159 = vector.load %arg14[%c0_58, %c0_59, %c0_60] : memref<2x256x128xbf16, #tpu.memory_space<vmem>>, vector<1x256x128xbf16>
    %160 = vector.shape_cast %159 : vector<1x256x128xbf16> to vector<256x128xbf16>
    %cst_61 = arith.constant dense<0.000000e+00> : vector<16x128xf32>
    %161 = tpu.matmul %158, %160, %cst_61 {dimension_numbers = #tpu.dot_dimension_numbers<[1], [0], [0], [1], [0, 0, 1, 1], [], []>} : vector<16x256xbf16>, vector<256x128xbf16>, vector<16x128xf32> -> vector<16x128xf32>
    %c0_62 = arith.constant 0 : index
    %c0_63 = arith.constant 0 : index
    %c0_64 = arith.constant 0 : index
    %162 = vector.load %arg15[%c0_62, %c0_63, %c0_64] : memref<2x1x128xf32, #tpu.memory_space<vmem>>, vector<1x1x128xf32>
    %163 = vector.shape_cast %162 : vector<1x1x128xf32> to vector<1x128xf32>
    %164 = vector.broadcast %163 : vector<1x128xf32> to vector<16x128xf32>
    %165 = arith.addf %161, %164 : vector<16x128xf32>
    %166 = arith.addf %136, %165 : vector<16x128xf32>
    %c0_65 = arith.constant 0 : index
    %c0_66 = arith.constant 0 : index
    %c0_67 = arith.constant 0 : index
    %167 = vector.load %arg16[%c0_65, %c0_66, %c0_67] : memref<2x1x128xf32, #tpu.memory_space<vmem>>, vector<1x1x128xf32>
    %168 = vector.shape_cast %167 : vector<1x1x128xf32> to vector<1x128xf32>
    %c0_68 = arith.constant 0 : index
    %c0_69 = arith.constant 0 : index
    %c0_70 = arith.constant 0 : index
    %169 = vector.load %arg17[%c0_68, %c0_69, %c0_70] : memref<2x1x128xf32, #tpu.memory_space<vmem>>, vector<1x1x128xf32>
    %170 = vector.shape_cast %169 : vector<1x1x128xf32> to vector<1x128xf32>
    %cst_71 = arith.constant dense<0.000000e+00> : vector<16xf32>
    %171 = vector.multi_reduction <add>, %166, %cst_71 [1] : vector<16x128xf32> to vector<16xf32>
    %172 = vector.shape_cast %171 : vector<16xf32> to vector<16x1xf32>
    %cst_72 = arith.constant 1.280000e+02 : f32
    %173 = vector.broadcast %cst_72 : f32 to vector<16x1xf32>
    %174 = arith.divf %172, %173 : vector<16x1xf32>
    %175 = vector.broadcast %174 : vector<16x1xf32> to vector<16x128xf32>
    %176 = arith.subf %166, %175 : vector<16x128xf32>
    %177 = arith.mulf %176, %176 : vector<16x128xf32>
    %cst_73 = arith.constant dense<0.000000e+00> : vector<16xf32>
    %178 = vector.multi_reduction <add>, %177, %cst_73 [1] : vector<16x128xf32> to vector<16xf32>
    %179 = vector.shape_cast %178 : vector<16xf32> to vector<16x1xf32>
    %cst_74 = arith.constant 1.280000e+02 : f32
    %180 = vector.broadcast %cst_74 : f32 to vector<16x1xf32>
    %181 = arith.divf %179, %180 : vector<16x1xf32>
    %182 = vector.broadcast %174 : vector<16x1xf32> to vector<16x128xf32>
    %183 = arith.subf %166, %182 : vector<16x128xf32>
    %cst_75 = arith.constant 9.99999996E-13 : f32
    %184 = vector.broadcast %cst_75 : f32 to vector<16x1xf32>
    %185 = arith.addf %181, %184 : vector<16x1xf32>
    %186 = math.rsqrt %185 : vector<16x1xf32>
    %187 = vector.broadcast %186 : vector<16x1xf32> to vector<16x128xf32>
    %188 = arith.mulf %183, %187 : vector<16x128xf32>
    %189 = vector.broadcast %168 : vector<1x128xf32> to vector<16x128xf32>
    %190 = arith.mulf %188, %189 : vector<16x128xf32>
    %191 = vector.broadcast %170 : vector<1x128xf32> to vector<16x128xf32>
    %192 = arith.addf %190, %191 : vector<16x128xf32>
    %193 = arith.truncf %192 : vector<16x128xf32> to vector<16x128xbf16>
    %c1 = arith.constant 1 : index
    %c0_76 = arith.constant 0 : index
    %c0_77 = arith.constant 0 : index
    %194 = vector.load %arg6[%c1, %c0_76, %c0_77] : memref<2x128x384xbf16, #tpu.memory_space<vmem>>, vector<1x128x384xbf16>
    %195 = vector.shape_cast %194 : vector<1x128x384xbf16> to vector<128x384xbf16>
    %cst_78 = arith.constant dense<0.000000e+00> : vector<16x384xf32>
    %196 = tpu.matmul %193, %195, %cst_78 {dimension_numbers = #tpu.dot_dimension_numbers<[1], [0], [0], [1], [0, 0, 1, 1], [], []>} : vector<16x128xbf16>, vector<128x384xbf16>, vector<16x384xf32> -> vector<16x384xf32>
    %c1_79 = arith.constant 1 : index
    %c0_80 = arith.constant 0 : index
    %c0_81 = arith.constant 0 : index
    %197 = vector.load %arg7[%c1_79, %c0_80, %c0_81] : memref<2x1x384xf32, #tpu.memory_space<vmem>>, vector<1x1x384xf32>
    %198 = vector.shape_cast %197 : vector<1x1x384xf32> to vector<1x384xf32>
    %199 = vector.broadcast %198 : vector<1x384xf32> to vector<16x384xf32>
    %200 = arith.addf %196, %199 : vector<16x384xf32>
    %201 = vector.extract_strided_slice %200 {offsets = [0, 0], sizes = [8, 64], strides = [1, 1]} : vector<16x384xf32> to vector<8x64xf32>
    %202 = vector.extract_strided_slice %200 {offsets = [0, 128], sizes = [8, 64], strides = [1, 1]} : vector<16x384xf32> to vector<8x64xf32>
    %203 = vector.extract_strided_slice %200 {offsets = [0, 256], sizes = [8, 64], strides = [1, 1]} : vector<16x384xf32> to vector<8x64xf32>
    %204 = vector.extract_strided_slice %200 {offsets = [0, 64], sizes = [8, 64], strides = [1, 1]} : vector<16x384xf32> to vector<8x64xf32>
    %205 = vector.extract_strided_slice %200 {offsets = [0, 192], sizes = [8, 64], strides = [1, 1]} : vector<16x384xf32> to vector<8x64xf32>
    %206 = vector.extract_strided_slice %200 {offsets = [0, 320], sizes = [8, 64], strides = [1, 1]} : vector<16x384xf32> to vector<8x64xf32>
    %207 = vector.extract_strided_slice %200 {offsets = [8, 0], sizes = [8, 64], strides = [1, 1]} : vector<16x384xf32> to vector<8x64xf32>
    %208 = vector.extract_strided_slice %200 {offsets = [8, 128], sizes = [8, 64], strides = [1, 1]} : vector<16x384xf32> to vector<8x64xf32>
    %209 = vector.extract_strided_slice %200 {offsets = [8, 256], sizes = [8, 64], strides = [1, 1]} : vector<16x384xf32> to vector<8x64xf32>
    %210 = vector.extract_strided_slice %200 {offsets = [8, 64], sizes = [8, 64], strides = [1, 1]} : vector<16x384xf32> to vector<8x64xf32>
    %211 = vector.extract_strided_slice %200 {offsets = [8, 192], sizes = [8, 64], strides = [1, 1]} : vector<16x384xf32> to vector<8x64xf32>
    %212 = vector.extract_strided_slice %200 {offsets = [8, 320], sizes = [8, 64], strides = [1, 1]} : vector<16x384xf32> to vector<8x64xf32>
    %213 = vector.shape_cast %201 : vector<8x64xf32> to vector<1x8x64xf32>
    %214 = vector.shape_cast %204 : vector<8x64xf32> to vector<1x8x64xf32>
    %215 = vector.shape_cast %207 : vector<8x64xf32> to vector<1x8x64xf32>
    %216 = vector.shape_cast %210 : vector<8x64xf32> to vector<1x8x64xf32>
    %217 = tpu.concatenate %213, %214, %215, %216 in 0 : vector<1x8x64xf32>, vector<1x8x64xf32>, vector<1x8x64xf32>, vector<1x8x64xf32> -> vector<4x8x64xf32>
    %218 = arith.truncf %217 : vector<4x8x64xf32> to vector<4x8x64xbf16>
    %219 = vector.shape_cast %202 : vector<8x64xf32> to vector<1x8x64xf32>
    %220 = vector.shape_cast %205 : vector<8x64xf32> to vector<1x8x64xf32>
    %221 = vector.shape_cast %208 : vector<8x64xf32> to vector<1x8x64xf32>
    %222 = vector.shape_cast %211 : vector<8x64xf32> to vector<1x8x64xf32>
    %223 = tpu.concatenate %219, %220, %221, %222 in 0 : vector<1x8x64xf32>, vector<1x8x64xf32>, vector<1x8x64xf32>, vector<1x8x64xf32> -> vector<4x8x64xf32>
    %224 = arith.truncf %223 : vector<4x8x64xf32> to vector<4x8x64xbf16>
    %225 = vector.shape_cast %203 : vector<8x64xf32> to vector<1x8x64xf32>
    %226 = vector.shape_cast %206 : vector<8x64xf32> to vector<1x8x64xf32>
    %227 = vector.shape_cast %209 : vector<8x64xf32> to vector<1x8x64xf32>
    %228 = vector.shape_cast %212 : vector<8x64xf32> to vector<1x8x64xf32>
    %229 = tpu.concatenate %225, %226, %227, %228 in 0 : vector<1x8x64xf32>, vector<1x8x64xf32>, vector<1x8x64xf32>, vector<1x8x64xf32> -> vector<4x8x64xf32>
    %230 = arith.truncf %229 : vector<4x8x64xf32> to vector<4x8x64xbf16>
    "tpu.trace_start"() <{level = 10 : i32, message = "gqd,gkd->gqk"}> : () -> ()
    %cst_82 = arith.constant dense<0.000000e+00> : vector<4x8x8xf32>
    %231 = tpu.matmul %218, %224, %cst_82 {dimension_numbers = #tpu.dot_dimension_numbers<[2], [2], [1], [1], [0, 0, 0, 1, 1, 1], [0], [0]>} : vector<4x8x64xbf16>, vector<4x8x64xbf16>, vector<4x8x8xf32> -> vector<4x8x8xf32>
    "tpu.trace_stop"() : () -> ()
    %cst_83 = arith.constant 1.250000e-01 : f32
    %232 = vector.broadcast %cst_83 : f32 to vector<4x8x8xf32>
    %233 = arith.mulf %231, %232 : vector<4x8x8xf32>
    %234 = arith.addf %233, %0 : vector<4x8x8xf32>
    %cst_84 = arith.constant dense<0xFF800000> : vector<4x8xf32>
    %235 = vector.multi_reduction <maximumf>, %234, %cst_84 [2] : vector<4x8x8xf32> to vector<4x8xf32>
    %236 = vector.shape_cast %235 : vector<4x8xf32> to vector<4x8x1xf32>
    %237 = vector.broadcast %236 : vector<4x8x1xf32> to vector<4x8x8xf32>
    %238 = arith.subf %234, %237 : vector<4x8x8xf32>
    %239 = math.exp %238 : vector<4x8x8xf32>
    %cst_85 = arith.constant dense<0.000000e+00> : vector<4x8xf32>
    %240 = vector.multi_reduction <add>, %239, %cst_85 [2] : vector<4x8x8xf32> to vector<4x8xf32>
    %241 = vector.shape_cast %240 : vector<4x8xf32> to vector<4x8x1xf32>
    %242 = tpu.reciprocal %241 {approx = true} : vector<4x8x1xf32> -> vector<4x8x1xf32>
    %243 = vector.broadcast %242 : vector<4x8x1xf32> to vector<4x8x8xf32>
    %244 = arith.mulf %239, %243 : vector<4x8x8xf32>
    %245 = arith.truncf %244 : vector<4x8x8xf32> to vector<4x8x8xbf16>
    "tpu.trace_start"() <{level = 10 : i32, message = "gqk,gkd->gqd"}> : () -> ()
    %cst_86 = arith.constant dense<0.000000e+00> : vector<4x8x64xf32>
    %246 = tpu.matmul %245, %230, %cst_86 {dimension_numbers = #tpu.dot_dimension_numbers<[2], [1], [1], [2], [0, 0, 0, 1, 1, 2], [0], [0]>} : vector<4x8x8xbf16>, vector<4x8x64xbf16>, vector<4x8x64xf32> -> vector<4x8x64xf32>
    "tpu.trace_stop"() : () -> ()
    %247 = vector.extract_strided_slice %246 {offsets = [0, 0, 0], sizes = [1, 8, 64], strides = [1, 1, 1]} : vector<4x8x64xf32> to vector<1x8x64xf32>
    %248 = vector.shape_cast %247 : vector<1x8x64xf32> to vector<8x64xf32>
    %249 = vector.extract_strided_slice %246 {offsets = [1, 0, 0], sizes = [1, 8, 64], strides = [1, 1, 1]} : vector<4x8x64xf32> to vector<1x8x64xf32>
    %250 = vector.shape_cast %249 : vector<1x8x64xf32> to vector<8x64xf32>
    %251 = tpu.concatenate %248, %250 in 1 : vector<8x64xf32>, vector<8x64xf32> -> vector<8x128xf32>
    %252 = vector.extract_strided_slice %246 {offsets = [2, 0, 0], sizes = [1, 8, 64], strides = [1, 1, 1]} : vector<4x8x64xf32> to vector<1x8x64xf32>
    %253 = vector.shape_cast %252 : vector<1x8x64xf32> to vector<8x64xf32>
    %254 = vector.extract_strided_slice %246 {offsets = [3, 0, 0], sizes = [1, 8, 64], strides = [1, 1, 1]} : vector<4x8x64xf32> to vector<1x8x64xf32>
    %255 = vector.shape_cast %254 : vector<1x8x64xf32> to vector<8x64xf32>
    %256 = tpu.concatenate %253, %255 in 1 : vector<8x64xf32>, vector<8x64xf32> -> vector<8x128xf32>
    %257 = tpu.concatenate %251, %256 in 0 : vector<8x128xf32>, vector<8x128xf32> -> vector<16x128xf32>
    %258 = arith.truncf %257 : vector<16x128xf32> to vector<16x128xbf16>
    %c1_87 = arith.constant 1 : index
    %c0_88 = arith.constant 0 : index
    %c0_89 = arith.constant 0 : index
    %259 = vector.load %arg8[%c1_87, %c0_88, %c0_89] : memref<2x128x128xbf16, #tpu.memory_space<vmem>>, vector<1x128x128xbf16>
    %260 = vector.shape_cast %259 : vector<1x128x128xbf16> to vector<128x128xbf16>
    %cst_90 = arith.constant dense<0.000000e+00> : vector<16x128xf32>
    %261 = tpu.matmul %258, %260, %cst_90 {dimension_numbers = #tpu.dot_dimension_numbers<[1], [0], [0], [1], [0, 0, 1, 1], [], []>} : vector<16x128xbf16>, vector<128x128xbf16>, vector<16x128xf32> -> vector<16x128xf32>
    %c1_91 = arith.constant 1 : index
    %c0_92 = arith.constant 0 : index
    %c0_93 = arith.constant 0 : index
    %262 = vector.load %arg9[%c1_91, %c0_92, %c0_93] : memref<2x1x128xf32, #tpu.memory_space<vmem>>, vector<1x1x128xf32>
    %263 = vector.shape_cast %262 : vector<1x1x128xf32> to vector<1x128xf32>
    %264 = vector.broadcast %263 : vector<1x128xf32> to vector<16x128xf32>
    %265 = arith.addf %261, %264 : vector<16x128xf32>
    %266 = arith.addf %192, %265 : vector<16x128xf32>
    %c1_94 = arith.constant 1 : index
    %c0_95 = arith.constant 0 : index
    %c0_96 = arith.constant 0 : index
    %267 = vector.load %arg10[%c1_94, %c0_95, %c0_96] : memref<2x1x128xf32, #tpu.memory_space<vmem>>, vector<1x1x128xf32>
    %268 = vector.shape_cast %267 : vector<1x1x128xf32> to vector<1x128xf32>
    %c1_97 = arith.constant 1 : index
    %c0_98 = arith.constant 0 : index
    %c0_99 = arith.constant 0 : index
    %269 = vector.load %arg11[%c1_97, %c0_98, %c0_99] : memref<2x1x128xf32, #tpu.memory_space<vmem>>, vector<1x1x128xf32>
    %270 = vector.shape_cast %269 : vector<1x1x128xf32> to vector<1x128xf32>
    %cst_100 = arith.constant dense<0.000000e+00> : vector<16xf32>
    %271 = vector.multi_reduction <add>, %266, %cst_100 [1] : vector<16x128xf32> to vector<16xf32>
    %272 = vector.shape_cast %271 : vector<16xf32> to vector<16x1xf32>
    %cst_101 = arith.constant 1.280000e+02 : f32
    %273 = vector.broadcast %cst_101 : f32 to vector<16x1xf32>
    %274 = arith.divf %272, %273 : vector<16x1xf32>
    %275 = vector.broadcast %274 : vector<16x1xf32> to vector<16x128xf32>
    %276 = arith.subf %266, %275 : vector<16x128xf32>
    %277 = arith.mulf %276, %276 : vector<16x128xf32>
    %cst_102 = arith.constant dense<0.000000e+00> : vector<16xf32>
    %278 = vector.multi_reduction <add>, %277, %cst_102 [1] : vector<16x128xf32> to vector<16xf32>
    %279 = vector.shape_cast %278 : vector<16xf32> to vector<16x1xf32>
    %cst_103 = arith.constant 1.280000e+02 : f32
    %280 = vector.broadcast %cst_103 : f32 to vector<16x1xf32>
    %281 = arith.divf %279, %280 : vector<16x1xf32>
    %282 = vector.broadcast %274 : vector<16x1xf32> to vector<16x128xf32>
    %283 = arith.subf %266, %282 : vector<16x128xf32>
    %cst_104 = arith.constant 9.99999996E-13 : f32
    %284 = vector.broadcast %cst_104 : f32 to vector<16x1xf32>
    %285 = arith.addf %281, %284 : vector<16x1xf32>
    %286 = math.rsqrt %285 : vector<16x1xf32>
    %287 = vector.broadcast %286 : vector<16x1xf32> to vector<16x128xf32>
    %288 = arith.mulf %283, %287 : vector<16x128xf32>
    %289 = vector.broadcast %268 : vector<1x128xf32> to vector<16x128xf32>
    %290 = arith.mulf %288, %289 : vector<16x128xf32>
    %291 = vector.broadcast %270 : vector<1x128xf32> to vector<16x128xf32>
    %292 = arith.addf %290, %291 : vector<16x128xf32>
    %293 = arith.truncf %292 : vector<16x128xf32> to vector<16x128xbf16>
    %c1_105 = arith.constant 1 : index
    %c0_106 = arith.constant 0 : index
    %c0_107 = arith.constant 0 : index
    %294 = vector.load %arg12[%c1_105, %c0_106, %c0_107] : memref<2x128x256xbf16, #tpu.memory_space<vmem>>, vector<1x128x256xbf16>
    %295 = vector.shape_cast %294 : vector<1x128x256xbf16> to vector<128x256xbf16>
    %cst_108 = arith.constant dense<0.000000e+00> : vector<16x256xf32>
    %296 = tpu.matmul %293, %295, %cst_108 {dimension_numbers = #tpu.dot_dimension_numbers<[1], [0], [0], [1], [0, 0, 1, 1], [], []>} : vector<16x128xbf16>, vector<128x256xbf16>, vector<16x256xf32> -> vector<16x256xf32>
    %c1_109 = arith.constant 1 : index
    %c0_110 = arith.constant 0 : index
    %c0_111 = arith.constant 0 : index
    %297 = vector.load %arg13[%c1_109, %c0_110, %c0_111] : memref<2x1x256xf32, #tpu.memory_space<vmem>>, vector<1x1x256xf32>
    %298 = vector.shape_cast %297 : vector<1x1x256xf32> to vector<1x256xf32>
    %299 = vector.broadcast %298 : vector<1x256xf32> to vector<16x256xf32>
    %300 = arith.addf %296, %299 : vector<16x256xf32>
    %cst_112 = arith.constant 5.000000e-01 : f32
    %301 = vector.broadcast %cst_112 : f32 to vector<16x256xf32>
    %302 = arith.mulf %301, %300 : vector<16x256xf32>
    %cst_113 = arith.constant 4.471500e-02 : f32
    %303 = vector.broadcast %cst_113 : f32 to vector<16x256xf32>
    %304 = arith.mulf %303, %300 : vector<16x256xf32>
    %305 = arith.mulf %304, %300 : vector<16x256xf32>
    %306 = arith.mulf %305, %300 : vector<16x256xf32>
    %307 = arith.addf %300, %306 : vector<16x256xf32>
    %cst_114 = arith.constant 0.797884583 : f32
    %308 = vector.broadcast %cst_114 : f32 to vector<16x256xf32>
    %309 = arith.mulf %308, %307 : vector<16x256xf32>
    %310 = math.tanh %309 : vector<16x256xf32>
    %cst_115 = arith.constant 1.000000e+00 : f32
    %311 = vector.broadcast %cst_115 : f32 to vector<16x256xf32>
    %312 = arith.addf %311, %310 : vector<16x256xf32>
    %313 = arith.mulf %302, %312 : vector<16x256xf32>
    %314 = arith.truncf %313 : vector<16x256xf32> to vector<16x256xbf16>
    %c1_116 = arith.constant 1 : index
    %c0_117 = arith.constant 0 : index
    %c0_118 = arith.constant 0 : index
    %315 = vector.load %arg14[%c1_116, %c0_117, %c0_118] : memref<2x256x128xbf16, #tpu.memory_space<vmem>>, vector<1x256x128xbf16>
    %316 = vector.shape_cast %315 : vector<1x256x128xbf16> to vector<256x128xbf16>
    %cst_119 = arith.constant dense<0.000000e+00> : vector<16x128xf32>
    %317 = tpu.matmul %314, %316, %cst_119 {dimension_numbers = #tpu.dot_dimension_numbers<[1], [0], [0], [1], [0, 0, 1, 1], [], []>} : vector<16x256xbf16>, vector<256x128xbf16>, vector<16x128xf32> -> vector<16x128xf32>
    %c1_120 = arith.constant 1 : index
    %c0_121 = arith.constant 0 : index
    %c0_122 = arith.constant 0 : index
    %318 = vector.load %arg15[%c1_120, %c0_121, %c0_122] : memref<2x1x128xf32, #tpu.memory_space<vmem>>, vector<1x1x128xf32>
    %319 = vector.shape_cast %318 : vector<1x1x128xf32> to vector<1x128xf32>
    %320 = vector.broadcast %319 : vector<1x128xf32> to vector<16x128xf32>
    %321 = arith.addf %317, %320 : vector<16x128xf32>
    %322 = arith.addf %292, %321 : vector<16x128xf32>
    %c1_123 = arith.constant 1 : index
    %c0_124 = arith.constant 0 : index
    %c0_125 = arith.constant 0 : index
    %323 = vector.load %arg16[%c1_123, %c0_124, %c0_125] : memref<2x1x128xf32, #tpu.memory_space<vmem>>, vector<1x1x128xf32>
    %324 = vector.shape_cast %323 : vector<1x1x128xf32> to vector<1x128xf32>
    %c1_126 = arith.constant 1 : index
    %c0_127 = arith.constant 0 : index
    %c0_128 = arith.constant 0 : index
    %325 = vector.load %arg17[%c1_126, %c0_127, %c0_128] : memref<2x1x128xf32, #tpu.memory_space<vmem>>, vector<1x1x128xf32>
    %326 = vector.shape_cast %325 : vector<1x1x128xf32> to vector<1x128xf32>
    %cst_129 = arith.constant dense<0.000000e+00> : vector<16xf32>
    %327 = vector.multi_reduction <add>, %322, %cst_129 [1] : vector<16x128xf32> to vector<16xf32>
    %328 = vector.shape_cast %327 : vector<16xf32> to vector<16x1xf32>
    %cst_130 = arith.constant 1.280000e+02 : f32
    %329 = vector.broadcast %cst_130 : f32 to vector<16x1xf32>
    %330 = arith.divf %328, %329 : vector<16x1xf32>
    %331 = vector.broadcast %330 : vector<16x1xf32> to vector<16x128xf32>
    %332 = arith.subf %322, %331 : vector<16x128xf32>
    %333 = arith.mulf %332, %332 : vector<16x128xf32>
    %cst_131 = arith.constant dense<0.000000e+00> : vector<16xf32>
    %334 = vector.multi_reduction <add>, %333, %cst_131 [1] : vector<16x128xf32> to vector<16xf32>
    %335 = vector.shape_cast %334 : vector<16xf32> to vector<16x1xf32>
    %cst_132 = arith.constant 1.280000e+02 : f32
    %336 = vector.broadcast %cst_132 : f32 to vector<16x1xf32>
    %337 = arith.divf %335, %336 : vector<16x1xf32>
    %338 = vector.broadcast %330 : vector<16x1xf32> to vector<16x128xf32>
    %339 = arith.subf %322, %338 : vector<16x128xf32>
    %cst_133 = arith.constant 9.99999996E-13 : f32
    %340 = vector.broadcast %cst_133 : f32 to vector<16x1xf32>
    %341 = arith.addf %337, %340 : vector<16x1xf32>
    %342 = math.rsqrt %341 : vector<16x1xf32>
    %343 = vector.broadcast %342 : vector<16x1xf32> to vector<16x128xf32>
    %344 = arith.mulf %339, %343 : vector<16x128xf32>
    %345 = vector.broadcast %324 : vector<1x128xf32> to vector<16x128xf32>
    %346 = arith.mulf %344, %345 : vector<16x128xf32>
    %347 = vector.broadcast %326 : vector<1x128xf32> to vector<16x128xf32>
    %348 = arith.addf %346, %347 : vector<16x128xf32>
    %349 = vector.extract_strided_slice %348 {offsets = [0, 0], sizes = [1, 128], strides = [1, 1]} : vector<16x128xf32> to vector<1x128xf32>
    %350 = vector.extract_strided_slice %348 {offsets = [8, 0], sizes = [1, 128], strides = [1, 1]} : vector<16x128xf32> to vector<1x128xf32>
    %351 = tpu.concatenate %349, %350 in 0 : vector<1x128xf32>, vector<1x128xf32> -> vector<2x128xf32>
    %c0_134 = arith.constant 0 : index
    %c0_135 = arith.constant 0 : index
    %352 = vector.load %arg18[%c0_134, %c0_135] : memref<1x128xf32, #tpu.memory_space<vmem>>, vector<1x128xf32>
    %353 = vector.broadcast %352 : vector<1x128xf32> to vector<2x128xf32>
    %354 = arith.mulf %351, %353 : vector<2x128xf32>
    %cst_136 = arith.constant dense<0.000000e+00> : vector<2xf32>
    %355 = vector.multi_reduction <add>, %354, %cst_136 [1] : vector<2x128xf32> to vector<2xf32>
    %356 = vector.shape_cast %355 : vector<2xf32> to vector<2x1xf32>
    %c0_137 = arith.constant 0 : index
    %c0_138 = arith.constant 0 : index
    %357 = vector.load %arg19[%c0_137, %c0_138] : memref<1x1xf32, #tpu.memory_space<vmem>>, vector<1x1xf32>
    %358 = vector.broadcast %357 : vector<1x1xf32> to vector<2x1xf32>
    %359 = arith.addf %356, %358 : vector<2x1xf32>
    %c0_139 = arith.constant 0 : index
    %c0_140 = arith.constant 0 : index
    %360 = vector.load %arg20[%c0_139, %c0_140] : memref<2x1xf32, #tpu.memory_space<vmem>>, vector<2x1xf32>
    tpu.vector_store %arg20[%c0_139, %c0_140], %359 {strides = array<i32>} : memref<2x1xf32, #tpu.memory_space<vmem>>, vector<2x1xf32>,
    return
  }
}

</mosaic_0001>

<bundles_post_ra>
// kernel: sentiment_forward.1
= control target key start
LH: loop header
LB: loop body
LE: loop exit
PB: predicated region body
PF: predicated region fallthrough
CT: control target
= control target key end

     0   :  { %s4483_s0 = inlined_call_operand.vmem [shape: s32[16,1], index: 0, kind: input, shape index: {}]   ;;  %s4484_s1 = inlined_call_operand.vmem [shape: f32[4,8,8], index: 1, kind: input, shape index: {}]   ;;  %s4485_s2 = inlined_call_operand.vmem [shape: bf16[128,128], index: 2, kind: input, shape index: {}]   ;;  %s4486_s3 = inlined_call_operand.vmem [shape: f32[16,128], index: 3, kind: input, shape index: {}]   ;;  %s4487_s4 = inlined_call_operand.vmem [shape: f32[1,128], index: 4, kind: input, shape index: {}]   ;;  %s4488_s5 = inlined_call_operand.vmem [shape: f32[1,128], index: 5, kind: input, shape index: {}]   ;;  %s4489_s6 = inlined_call_operand.hbm [shape: bf16[2,128,384], index: 6, kind: input, shape index: {}]   ;;  %s4490_s7 = inlined_call_operand.vmem [shape: f32[2,1,384], index: 7, kind: input, shape index: {}]   ;;  %s4491_s8 = inlined_call_operand.hbm [shape: bf16[2,128,128], index: 8, kind: input, shape index: {}]   ;;  %s4492_s9 = inlined_call_operand.vmem [shape: f32[2,1,128], index: 9, kind: input, shape index: {}]   ;;  %s4493_s10 = inlined_call_operand.hbm [shape: f32[2,1,128], index: 10, kind: input, shape index: {}]   ;;  %s4494_s11 = inlined_call_operand.hbm [shape: f32[2,1,128], index: 11, kind: input, shape index: {}]   ;;  %s4495_s12 = inlined_call_operand.hbm [shape: bf16[2,128,256], index: 12, kind: input, shape index: {}]   ;;  %s4496_s13 = inlined_call_operand.vmem [shape: f32[2,1,256], index: 13, kind: input, shape index: {}]   ;;  %s4497_s14 = inlined_call_operand.hbm [shape: bf16[2,256,128], index: 14, kind: input, shape index: {}]   ;;  %s4498_s15 = inlined_call_operand.vmem [shape: f32[2,1,128], index: 15, kind: input, shape index: {}]   ;;  %s4499_s16 = inlined_call_operand.hbm [shape: f32[2,1,128], index: 16, kind: input, shape index: {}]   ;;  %s4500_s17 = inlined_call_operand.vmem [shape: f32[2,1,128], index: 17, kind: input, shape index: {}]   ;;  %s4501_s18 = inlined_call_operand.vmem [shape: f32[1,128], index: 18, kind: input, shape index: {}]   ;;  %s4502_s19 = inlined_call_operand.<no memory space> [shape: f32[1,1], index: 19, kind: input, shape index: {}]   ;;  %s4503_s20 = inlined_call_operand.vmem [shape: f32[2,1], index: 20, kind: output, shape index: {}]  }
   0x1   :  { %4507 = sst [smem:[#allocation18_spill]] %s4483_s0  ;;  %v25_v0 = vstv %s4502_s19 }
   0x2   :  { %4508 = sst [smem:[#allocation19_spill]] %s4484_s1  ;;  %26 = vst [vmem:[#allocation2] sm:$0x1] %v25_v0 }
   0x3   :  { %4509 = sst [smem:[#allocation20_spill]] %s4485_s2 }
   0x4   :  { %4510 = sst [smem:[#allocation21_spill]] %s4486_s3 }
   0x5   :  { %4511 = sst [smem:[#allocation22_spill]] %s4487_s4 }
   0x6   :  { %27 = vsyncpa [#allocation4], 0 }
   0x7   :  { %28 = vsyncpa [#allocation6], 0 }
   0x8   :  { %29 = vsyncpa [#allocation9], 0 }
   0x9   :  { %30 = vsyncpa [#allocation12], 0  ;;  %s3893_s23 = smov [#allocation5]   ;;  %s3731_s3 = scalar_lea.hbm %s4491_s8, 2048 }
   0xa   :  { %s62_s24 = sshll.u32 %s3893_s23, 4  ;;  %p3732_p0 = scmp.ne.s32.totalorder %s4491_s8, %s3731_s3  ;;  %s63_s24 = int_to_ptr.vmem [resolvable:$true] %s62_s24 }
   0xb   :  { %p3735_p1 = scmp.lt.u32.totalorder %s3731_s3, %s4491_s8 }
   0xd   :  { %p3737_p2 = pnand %p3735_p1, %p3732_p0 }
   0xf   :  { %3740 = shalt.err (!%p3737_p2)
}
  0x10   :  { %s3741_s19 = scalar_lea.vmem %s63_s24, 2048  ;;  %p3746_p4 = scmp.lt.s32.totalorder %s63_s24, %s63_s24 }
  0x11   :  { %p3742_p3 = scmp.ne.s32.totalorder %s63_s24, %s3741_s19  ;;  %p3747_p5 = scmp.lt.s32.totalorder %s3741_s19, %s3741_s19 }
  0x13   :  { %p3748_p6 = por %p3747_p5, %p3746_p4 }
  0x15   :  { %p3749_p7 = pnand %p3748_p6, %p3742_p3 }
  0x17   :  { %3752 = shalt.err (!%p3749_p7)
}
  0x18   :  { %s3894_s29 = smov 64   ;;  %s3895_s30 = smov 4  }
  0x19   :  { %68 = dma.hbm_to_vmem [thread:$0]  %s4491_s8, 2048, %s63_s24, [#allocation6], %s3894_s29, %s3894_s29, %s3895_s30  }
  0x1a   :  { %s3896_s1 = smov [#allocation8]   ;;  %s3897_s23 = smov [#allocation11]  }
  0x1b   :  { %s88_s22 = sshll.u32 %s3896_s1, 4  ;;  %s114_s2 = sshll.u32 %s3897_s23, 4  ;;  %s89_s22 = int_to_ptr.vmem [resolvable:$true] %s88_s22  ;;  %s115_s2 = int_to_ptr.vmem [resolvable:$true] %s114_s2 }
  0x1c   :  { %s3753_s26 = scalar_lea.hbm %s4494_s11, 32 }
  0x1d   :  { %p3754_p8 = scmp.ne.s32.totalorder %s4494_s11, %s3753_s26  ;;  %p3757_p9 = scmp.lt.u32.totalorder %s3753_s26, %s4494_s11 }
  0x1f   :  { %p3759_p10 = pnand %p3757_p9, %p3754_p8 }
  0x21   :  { %3762 = shalt.err (!%p3759_p10)
}
  0x22   :  { %s3763_s8 = scalar_lea.vmem %s89_s22, 32  ;;  %p3768_p12 = scmp.lt.s32.totalorder %s89_s22, %s89_s22 }
  0x23   :  { %p3764_p11 = scmp.ne.s32.totalorder %s89_s22, %s3763_s8  ;;  %p3769_p13 = scmp.lt.s32.totalorder %s3763_s8, %s3763_s8 }
  0x25   :  { %p3770_p0 = por %p3769_p13, %p3768_p12 }
  0x27   :  { %p3771_p1 = pnand %p3770_p0, %p3764_p11 }
  0x29   :  { %3774 = shalt.err (!%p3771_p1)
}
  0x2a   :  { %s3898_s24 = smov 16   ;;  %s3899_s0 = smov 1  }
  0x2b   :  { %94 = dma.hbm_to_vmem [thread:$0]  %s4494_s11, 32, %s89_s22, [#allocation9], %s3898_s24, %s3898_s24, %s3899_s0  }
  0x2c   :  { %s3775_s3 = scalar_lea.hbm %s4497_s14, 4096 }
  0x2d   :  { %p3776_p2 = scmp.ne.s32.totalorder %s4497_s14, %s3775_s3  ;;  %p3779_p3 = scmp.lt.u32.totalorder %s3775_s3, %s4497_s14 }
  0x2f   :  { %p3781_p4 = pnand %p3779_p3, %p3776_p2 }
  0x31   :  { %3784 = shalt.err (!%p3781_p4)
}
  0x32   :  { %s3785_s19 = scalar_lea.vmem %s115_s2, 4096  ;;  %p3790_p6 = scmp.lt.s32.totalorder %s115_s2, %s115_s2 }
  0x33   :  { %p3786_p5 = scmp.ne.s32.totalorder %s115_s2, %s3785_s19  ;;  %p3791_p7 = scmp.lt.s32.totalorder %s3785_s19, %s3785_s19 }
  0x35   :  { %p3792_p8 = por %p3791_p7, %p3790_p6 }
  0x37   :  { %p3793_p9 = pnand %p3792_p8, %p3786_p5 }
  0x39   :  { %3796 = shalt.err (!%p3793_p9)
}
  0x3a   :  { %120 = dma.hbm_to_vmem [thread:$0]  %s4497_s14, 4096, %s115_s2, [#allocation12], %s3894_s29, %s3894_s29, %s3895_s30  }
  0x3b   :  { %s3900_s8 = smov [#allocation3]   ;;  %s3797_s25 = scalar_lea.hbm %s4489_s6, 6144 }
  0x3c   :  { %s48_s21 = sshll.u32 %s3900_s8, 4  ;;  %p3798_p10 = scmp.ne.s32.totalorder %s4489_s6, %s3797_s25  ;;  %s49_s21 = int_to_ptr.vmem [resolvable:$true] %s48_s21 }
  0x3d   :  { %p3801_p11 = scmp.lt.u32.totalorder %s3797_s25, %s4489_s6 }
  0x3f   :  { %p3803_p12 = pnand %p3801_p11, %p3798_p10 }
  0x41   :  { %3806 = shalt.err (!%p3803_p12)
}
  0x42   :  { %s3807_s4 = scalar_lea.vmem %s49_s21, 6144  ;;  %p3812_p0 = scmp.lt.s32.totalorder %s49_s21, %s49_s21 }
  0x43   :  { %p3808_p13 = scmp.ne.s32.totalorder %s49_s21, %s3807_s4  ;;  %p3813_p1 = scmp.lt.s32.totalorder %s3807_s4, %s3807_s4 }
  0x45   :  { %p3814_p2 = por %p3813_p1, %p3812_p0 }
  0x47   :  { %p3815_p3 = pnand %p3814_p2, %p3808_p13 }
  0x49   :  { %3818 = shalt.err (!%p3815_p3)
}
  0x4a   :  { %s3901_s14 = smov 192   ;;  %s3902_s30 = smov 12  }
  0x4b   :  { %54 = dma.hbm_to_vmem [thread:$0]  %s4489_s6, 6144, %s49_s21, [#allocation4], %s3901_s14, %s3901_s14, %s3902_s30  }
  0x4c   :  { %s3903_s11 = smov [#allocation7]   ;;  %s3904_s8 = smov [#allocation10]  }
  0x4d   :  { %s76_s22 = sshll.u32 %s3903_s11, 4  ;;  %s100_s1 = sshll.u32 %s3904_s8, 4  ;;  %s77_s22 = int_to_ptr.vmem [resolvable:$true] %s76_s22  ;;  %s4077_s1 = int_to_ptr.vmem [resolvable:$true] %s100_s1 }
  0x4e   :  { %s3819_s3 = scalar_lea.hbm %s4493_s10, 32 }
  0x4f   :  { %p3820_p4 = scmp.ne.s32.totalorder %s4493_s10, %s3819_s3  ;;  %p3823_p5 = scmp.lt.u32.totalorder %s3819_s3, %s4493_s10 }
  0x51   :  { %p3825_p6 = pnand %p3823_p5, %p3820_p4 }
  0x53   :  { %3828 = shalt.err (!%p3825_p6)
}
  0x54   :  { %s3829_s6 = scalar_lea.vmem %s77_s22, 32  ;;  %p3834_p8 = scmp.lt.s32.totalorder %s77_s22, %s77_s22 }
  0x55   :  { %p3830_p7 = scmp.ne.s32.totalorder %s77_s22, %s3829_s6  ;;  %p3835_p9 = scmp.lt.s32.totalorder %s3829_s6, %s3829_s6 }
  0x57   :  { %p3836_p10 = por %p3835_p9, %p3834_p8 }
  0x59   :  { %p3837_p11 = pnand %p3836_p10, %p3830_p7 }
  0x5b   :  { %3840 = shalt.err (!%p3837_p11)
}
  0x5c   :  { %82 = dma.hbm_to_vmem [thread:$0]  %s4493_s10, 32, %s77_s22, [#allocation6], %s3898_s24, %s3898_s24, %s3899_s0  }
  0x5d   :  { %s3841_s19 = scalar_lea.hbm %s4495_s12, 4096 }
  0x5e   :  { %p3842_p12 = scmp.ne.s32.totalorder %s4495_s12, %s3841_s19  ;;  %p3845_p13 = scmp.lt.u32.totalorder %s3841_s19, %s4495_s12 }
  0x60   :  { %p3847_p0 = pnand %p3845_p13, %p3842_p12 }
  0x62   :  { %3850 = shalt.err (!%p3847_p0)
}
  0x63   :  { %s3851_s3 = scalar_lea.vmem %s4077_s1, 4096  ;;  %p3856_p2 = scmp.lt.s32.totalorder %s4077_s1, %s4077_s1 }
  0x64   :  { %p3852_p1 = scmp.ne.s32.totalorder %s4077_s1, %s3851_s3  ;;  %p3857_p3 = scmp.lt.s32.totalorder %s3851_s3, %s3851_s3 }
  0x66   :  { %p3858_p4 = por %p3857_p3, %p3856_p2 }
  0x68   :  { %p3859_p5 = pnand %p3858_p4, %p3852_p1 }
  0x6a   :  { %3862 = shalt.err (!%p3859_p5)
}
  0x6b   :  { %s3905_s10 = smov 128   ;;  %s3906_s22 = smov 8  }
  0x6c   :  { %106 = dma.hbm_to_vmem [thread:$0]  %s4495_s12, 4096, %s4077_s1, [#allocation9], %s3905_s10, %s3905_s10, %s3906_s22  }
  0x6d   :  { %s3907_s28 = smov [#allocation13]   ;;  %s3863_s14 = scalar_lea.hbm %s4499_s16, 32 }
  0x6e   :  { %s128_s4 = sshll.u32 %s3907_s28, 4  ;;  %p3864_p6 = scmp.ne.s32.totalorder %s4499_s16, %s3863_s14  ;;  %s129_s4 = int_to_ptr.vmem [resolvable:$true] %s128_s4 }
  0x6f   :  { %p3867_p7 = scmp.lt.u32.totalorder %s3863_s14, %s4499_s16 }
  0x71   :  { %p3869_p8 = pnand %p3867_p7, %p3864_p6 }
  0x73   :  { %3872 = shalt.err (!%p3869_p8)
}
  0x74   :  { %s3873_s8 = scalar_lea.vmem %s129_s4, 32  ;;  %p3878_p10 = scmp.lt.s32.totalorder %s129_s4, %s129_s4 }
  0x75   :  { %p3874_p9 = scmp.ne.s32.totalorder %s129_s4, %s3873_s8  ;;  %p3879_p11 = scmp.lt.s32.totalorder %s3873_s8, %s3873_s8 }
  0x77   :  { %p3880_p12 = por %p3879_p11, %p3878_p10 }
  0x79   :  { %p3881_p13 = pnand %p3880_p12, %p3874_p9 }
  0x7b   :  { %3884 = shalt.err (!%p3881_p13)
}
  0x7c   :  { %134 = dma.hbm_to_vmem [thread:$0]  %s4499_s16, 32, %s129_s4, [#allocation12], %s3898_s24, %s3898_s24, %s3899_s0  }
  0x7d   :  { %3885 = dma.done.wait [#allocation4], 6144  }
  0x7e   :  { %3886 = vsyncadd [#allocation4], 4294961152 }
  0x7f   :  { %3887 = dma.done.wait [#allocation6], 2080  }
  0x80   :  { %3888 = vsyncadd [#allocation6], 4294965216 }
  0x81   :  { %3889 = dma.done.wait [#allocation9], 4128  }
  0x82   :  { %3890 = vsyncadd [#allocation9], 4294963168 }
  0x83   :  { %3891 = dma.done.wait [#allocation12], 4128  }
  0x84   :  { %3892 = vsyncadd [#allocation12], 4294963168  ;;  %v3908_v1 = vmov 0   ;;  %v3909_v2 = vmov 0.0   ;;  %s4512_s3 = sld [smem:[#allocation18_spill]]  ;;  %s4513_s0 = sld [smem:[#allocation20_spill]]  ;;  %v169_v13 = vlaneseq }
  0x85   :  { %3484 = vset.pattern.permute.xlu0 %v3908_v1  ;;  %3269 = vmatprep.subr.bf16.mxu0 %v3909_v2  ;;  %vm3910_vm0 = vmmov 0   ;;  %v3911_v17 = vmov 1.0|1.0   ;;  %v3503_v25 = vld [vmem:[#allocation3 + $0x4] ss:$12 sps:$4 sm:$0xff]   ;;  %vm629_vm4 = vcmask 523264  }
  0x86   :  { %541 = vmatprep.mubr.bf16.mxu1 %v3908_v1  ;;  %3285 = vmatprep.mubr.msk.bf16.mxu0 %vm3910_vm0, %v3909_v2  ;;  %v170_v15 = vand.u32 127, %v169_v13  ;;  %v3505_v26 = vld [vmem:[#allocation3] ss:$12 sps:$4 sm:$0xff]   ;;  %v3506_v27 = vld [vmem:[#allocation3 + $0x8] ss:$12 sps:$4 sm:$0xff]   ;;  %vm874_vm5 = vcmask 1043456  }
  0x87   :  { %v3507_v28 = vld [vmem:[#allocation3 + $0x1c] ss:$12 sps:$4 sm:$0xff]   ;;  %509 = vmatprep.subr.bf16.mxu1 %v3503_v25  ;;  %v3509_v37 = vld [vmem:[#allocation3 + $0x18] ss:$12 sps:$4 sm:$0xff]   ;;  %v3510_v38 = vld [vmem:[#allocation3 + $0x20] ss:$12 sps:$4 sm:$0xff]  }
  0x88   :  { %510 = vmatpush1.bf16.msra.mxu1 %v3505_v26  ;;  %v3511_v39 = vld [vmem:[#allocation3 + $0x34] ss:$12 sps:$4 sm:$0xff]   ;;  %v3513_v40 = vld [vmem:[#allocation3 + $0x30] ss:$12 sps:$4 sm:$0xff]   ;;  %v3514_v41 = vld [vmem:[#allocation3 + $0x38] ss:$12 sps:$4 sm:$0xff]  }
  0x89   :  { %511 = vmatprep.subr.bf16.mxu1 %v3507_v28  ;;  %v3515_v42 = vld [vmem:[#allocation3 + $0x4c] ss:$12 sps:$4 sm:$0xff]   ;;  %v3517_v43 = vld [vmem:[#allocation3 + $0x48] ss:$12 sps:$4 sm:$0xff]   ;;  %v3518_v44 = vld [vmem:[#allocation3 + $0x50] ss:$12 sps:$4 sm:$0xff]  }
  0x8a   :  { %v167_v3 = vld [vmem:[%s4512_s3] sm:$0xff]  ;;  %v168_v5 = vld [vmem:[%s4512_s3 + $0x8] sm:$0xff]  ;;  %v3497_v7 = vld [vmem:[%s4513_s0 + $0x10] sm:$0xff]   ;;  %s4514_s3 = sld [smem:[#allocation21_spill]]  ;;  %s4516_s4 = sld [smem:[#allocation19_spill]]  ;;  %vm822_vm6 = vcmask 64512  }
  0x8b   :  { %172 = vperm.xlu0 %3484, %v167_v3   ;;  %v3495_v4 = vld [vmem:[%s4513_s0] sm:$0xff]   ;;  %v3496_v6 = vld [vmem:[%s4513_s0 + $0x8] sm:$0xff]   ;;  %v3498_v8 = vld [vmem:[%s4513_s0 + $0x18] sm:$0xff]   ;;  %vm2939_vm7 = vcmask 1040384   ;;  %vm2949_vm8 = vcmask 1041408   ;;  %vm2961_vm9 = vcmask 1024  }
  0x8c   :  { %3270 = vmatpush3.bf16.msra.mxu0 %v3495_v4  ;;  %v3499_v9 = vld [vmem:[%s4513_s0 + $0x20] sm:$0xff]   ;;  %v3500_v10 = vld [vmem:[%s4513_s0 + $0x28] sm:$0xff]   ;;  %v3501_v11 = vld [vmem:[%s4513_s0 + $0x30] sm:$0xff]   ;;  %512 = vmatpush1.bf16.msra.mxu1 %v3509_v37 }
  0x8d   :  { %3271 = vmatprep.subr.bf16.mxu0 %v3909_v2  ;;  %v3502_v12 = vld [vmem:[%s4513_s0 + $0x38] sm:$0xff]   ;;  %513 = vmatprep.subr.bf16.mxu1 %v3511_v39  ;;  %v3519_v45 = vld [vmem:[#allocation3 + $0x64] ss:$12 sps:$4 sm:$0xff]   ;;  %v3521_v46 = vld [vmem:[#allocation3 + $0x60] ss:$12 sps:$4 sm:$0xff]   ;;  %s4515_s0 = sld [smem:[#allocation22_spill]] }
  0x8e   :  { %v3522_v47 = vld [vmem:[#allocation3 + $0x68] ss:$12 sps:$4 sm:$0xff]   ;;  %v3525_v49 = vld [vmem:[#allocation3 + $0x78] ss:$12 sps:$4 sm:$0xff]   ;;  %v3526_v50 = vld [vmem:[#allocation3 + $0x80] ss:$12 sps:$4 sm:$0xff]  }
  0x8f   :  { %175 = vperm.xlu0 %3484, %v168_v5   ;;  %v3523_v48 = vld [vmem:[#allocation3 + $0x7c] ss:$12 sps:$4 sm:$0xff]   ;;  %v3527_v51 = vld [vmem:[#allocation3 + $0x94] ss:$12 sps:$4 sm:$0xff]   ;;  %v3530_v53 = vld [vmem:[#allocation3 + $0x98] ss:$12 sps:$4 sm:$0xff]  }
  0x90   :  { %3272 = vmatpush3.bf16.msra.mxu0 %v3496_v6  ;;  %v200_v18 = vld [vmem:[%s4514_s3] sm:$0xff]  ;;  %514 = vmatpush1.bf16.msra.mxu1 %v3513_v40  ;;  %v3531_v54 = vld [vmem:[#allocation3 + $0xac] ss:$12 sps:$4 sm:$0xff]   ;;  %v3533_v55 = vld [vmem:[#allocation3 + $0xa8] ss:$12 sps:$4 sm:$0xff]  }
  0x91   :  { %3273 = vmatprep.subr.bf16.mxu0 %v3909_v2  ;;  %515 = vmatprep.subr.bf16.mxu1 %v3515_v42  ;;  %v3529_v52 = vld [vmem:[#allocation3 + $0x90] ss:$12 sps:$4 sm:$0xff]  }
  0x92   :  { %v3534_v56 = vld [vmem:[#allocation3 + $0xb0] ss:$12 sps:$4 sm:$0xff]  }
  0x93   :  { %v2983_v3 = vld [vmem:[%s4515_s0] ss:$0 sm:$0xff] }
  0x94   :  { %3274 = vmatpush3.bf16.msra.mxu0 %v3497_v7  ;;  %516 = vmatpush1.bf16.msra.mxu1 %v3517_v43  ;;  %v2984_v7 = vld [vmem:[%s4488_s5] ss:$0 sm:$0xff] }
  0x95   :  { %3275 = vmatprep.subr.bf16.mxu0 %v3909_v2  ;;  %517 = vmatprep.subr.bf16.mxu1 %v3519_v45 }
  0x98   :  { %3276 = vmatpush3.bf16.msra.mxu0 %v3498_v8  ;;  %518 = vmatpush1.bf16.msra.mxu1 %v3521_v46 }
  0x99   :  { %3277 = vmatprep.subr.bf16.mxu0 %v3909_v2  ;;  %519 = vmatprep.subr.bf16.mxu1 %v3523_v48 }
  0x9c   :  { %3278 = vmatpush3.bf16.msra.mxu0 %v3499_v9  ;;  %520 = vmatpush1.bf16.msra.mxu1 %v3525_v49 }
  0x9d   :  { %3279 = vmatprep.subr.bf16.mxu0 %v3909_v2  ;;  %521 = vmatprep.subr.bf16.mxu1 %v3527_v51 }
  0xa0   :  { %3280 = vmatpush3.bf16.msra.mxu0 %v3500_v10  ;;  %522 = vmatpush1.bf16.msra.mxu1 %v3529_v52 }
  0xa1   :  { %3281 = vmatprep.subr.bf16.mxu0 %v3909_v2  ;;  %523 = vmatprep.subr.bf16.mxu1 %v3531_v54 }
  0xa4   :  { %3282 = vmatpush3.bf16.msra.mxu0 %v3501_v11  ;;  %524 = vmatpush1.bf16.msra.mxu1 %v3533_v55 }
  0xa5   :  { %3283 = vmatprep.subr.bf16.mxu0 %v3909_v2  ;;  %3309 = vmatprep.subr.bf16.mxu1 %v3909_v2 }
  0xa8   :  { %3284 = vmatpush3.bf16.msra.mxu0 %v3502_v12  ;;  %v4211_v12 = vshrl.u32 %v169_v13, 7 }
  0xa9   :  { %3289 = vmatprep.subr.bf16.mxu0 %v3909_v2 }
 0x10a   :  { %v173_v14 = vpop.permute.xlu0 %172 }
 0x10b   :  { %vm177_vm1 = vcmp.eq.s32.totalorder %v170_v15, %v173_v14  ;;  %v4214_v14 = vsub.s32 1, %v4211_v12 }
 0x10e   :  { %v176_v16 = vpop.permute.xlu0 %175 }
 0x10f   :  { %vm178_vm2 = vcmp.eq.s32.totalorder %v170_v15, %v176_v16  ;;  %v364_v15 = vld [vmem:[%s4490_s7] sm:$0x7]  ;;  %v376_v16 = vsub.s32 2, %v4211_v12 }
 0x110   :  { %vm2981_vm3 = vmpackc.low %vm178_vm2, %vm177_vm1 }
 0x111   :  { %3286 = vmatmul.mubr.msk.bf16.vlgmr.msra.gmra.mrb[0].mxu0 %vm2981_vm3, %v3911_v17  ;;  %v4221_v17 = vsub.s32 0, %v4211_v12  ;;  %v377_v13 = vrot.slane %v364_v15, %v376_v16 }
 0x112   :  { %3305 = vmatprep.mubr.msk.bf16.mxu0 %vm3910_vm0, %v3909_v2  ;;  %3290 = vmatpush3.bf16.msra.mxu0 %v3506_v27 }
 0x113   :  { %3291 = vmatprep.subr.bf16.mxu0 %v3909_v2 }
 0x116   :  { %3292 = vmatpush3.bf16.msra.mxu0 %v3510_v38 }
 0x117   :  { %3293 = vmatprep.subr.bf16.mxu0 %v3909_v2 }
 0x11a   :  { %3294 = vmatpush3.bf16.msra.mxu0 %v3514_v41 }
 0x11b   :  { %3295 = vmatprep.subr.bf16.mxu0 %v3909_v2 }
 0x11e   :  { %3296 = vmatpush3.bf16.msra.mxu0 %v3518_v44 }
 0x11f   :  { %3297 = vmatprep.subr.bf16.mxu0 %v3909_v2 }
 0x122   :  { %3298 = vmatpush3.bf16.msra.mxu0 %v3522_v47 }
 0x123   :  { %3299 = vmatprep.subr.bf16.mxu0 %v3909_v2 }
 0x126   :  { %3300 = vmatpush3.bf16.msra.mxu0 %v3526_v50 }
 0x127   :  { %3301 = vmatprep.subr.bf16.mxu0 %v3909_v2 }
 0x12a   :  { %3302 = vmatpush3.bf16.msra.mxu0 %v3530_v53  ;;  %v4262_v53 = vld [vmem:[%s4516_s4] sm:$0xff] }
 0x12b   :  { %3303 = vmatprep.subr.bf16.mxu0 %v3909_v2 }
 0x12e   :  { %3304 = vmatpush3.bf16.msra.mxu0 %v3534_v56 }
 0x12f   :  { %3357 = vmatprep.subr.bf16.mxu0 %v3909_v2 }
 0x1e4   :  { %v283_v19 = vpop.f32.mrb[0].mxu0 }
 0x1e5   :  { %v284_v20 = vadd.f32 %v283_v19, %v200_v18  ;;  %v3287_v21 = vpop.f32.mrb[1].mxu0 }
 0x1e6   :  { %v286_v22 = vpop.f32.mrb[2].mxu0 }
 0x1e7   :  { %292 = vadd.xlane.f32.xlu1 %v284_v20  ;;  %v3288_v23 = vpop.f32.mrb[3].mxu0  ;;  %v287_v24 = vadd.f32 %v286_v22, %v200_v18  ;;  %v373_v18 = vrot.slane %v364_v15, %v4214_v14 }
 0x1e8   :  { %v369_v23 = vrot.slane %v364_v15, %v4221_v17 }
 0x1eb   :  { %294 = vadd.xlane.f32.xlu1 %v287_v24 }
 0x274   :  { %v293_v29 = vpop.xlane.xlu1 %292 }
 0x275   :  { %v297_v30 = vmul.f32 0.0078125, %v293_v29 }
 0x277   :  { %v4176_v31 = vsub.f32 %v284_v20, %v297_v30 }
 0x278   :  { %v295_v32 = vpop.xlane.xlu1 %294 }
 0x279   :  { %v298_v33 = vmul.f32 0.0078125, %v295_v32  ;;  %v301_v34 = vmul.f32 %v4176_v31, %v4176_v31 }
 0x27b   :  { %v4180_v35 = vsub.f32 %v287_v24, %v298_v33  ;;  %303 = vadd.xlane.f32.xlu0 %v301_v34 }
 0x27d   :  { %v302_v36 = vmul.f32 %v4180_v35, %v4180_v35 }
 0x27f   :  { %305 = vadd.xlane.f32.xlu1 %v302_v36 }
 0x308   :  { %v304_v57 = vpop.xlane.xlu0 %303 }
 0x309   :  { %v307_v58 = vmul.f32 0.0078125, %v304_v57 }
 0x30b   :  { %v309_v59 = vadd.f32 1e-12, %v307_v58 }
 0x30c   :  { %v306_v60 = vpop.xlane.xlu1 %305 }
 0x30d   :  { %3663 = vrsqrt.f32 %v309_v59  ;;  %v308_v61 = vmul.f32 0.0078125, %v306_v60 }
 0x30f   :  { %v310_v62 = vadd.f32 1e-12, %v308_v61  ;;  %v4269_v61 = vld [vmem:[%s4516_s4 + $0x8] sm:$0xff] }
 0x311   :  { %3665 = vrsqrt.f32 %v310_v62 }
 0x317   :  { %v3664_v63 = vpop.eup %3663 }
 0x318   :  { %v313_v0 = vmul.f32 %v3664_v63, %v4176_v31 }
 0x31a   :  { %v321_v6 = vmul.f32 %v2983_v3, %v313_v0 }
 0x31b   :  { %v3666_v4 = vpop.eup %3665 }
 0x31c   :  { %v314_v5 = vmul.f32 %v3666_v4, %v4180_v35  ;;  %v4200_v9 = vadd.f32 %v2984_v7, %v321_v6 }
 0x31e   :  { %v322_v8 = vmul.f32 %v2983_v3, %v314_v5 }
 0x320   :  { %v4202_v10 = vadd.f32 %v2984_v7, %v322_v8  ;;  %v4276_v7 = vld [vmem:[%s4516_s4 + $0x10] sm:$0xff] }
 0x322   :  { %v331_v11 = vpack.c.bf16 %v4202_v10, %v4200_v9 }
 0x324   :  { %542 = vmatmul.mubr.bf16.vlgmr.msra.gmra.mrb[0].mxu1 %v331_v11  ;;  %3306 = vmatmul.mubr.bf16.vlgmr.msra.gmra.mrb[4].mxu0 %v331_v11 }
 0x325   :  { %3311 = vmatprep.mubr.msk.bf16.mxu1 %vm3910_vm0, %v3909_v2  ;;  %3373 = vmatprep.mubr.msk.bf16.mxu0 %vm3910_vm0, %v3909_v2 }
 0x3f7   :  { %v543_v19 = vpop.f32.mrb[0].mxu1  ;;  %v586_v20 = vpop.f32.mrb[4].mxu0 }
 0x3f8   :  { %v545_v21 = vpop.f32.mrb[1].mxu1  ;;  %v3307_v22 = vpop.f32.mrb[5].mxu0  ;;  %v544_v31 = vadd.f32 %v543_v19, %v369_v23  ;;  %v4245_v46 = vadd.f32 %v586_v20, %v377_v13 }
 0x3f9   :  { %v546_v24 = vadd.f32 %v545_v21, %v373_v18  ;;  %v547_v25 = vpop.f32.mrb[2].mxu1  ;;  %v589_v26 = vpop.f32.mrb[6].mxu0  ;;  %v4283_v21 = vld [vmem:[%s4516_s4 + $0x18] sm:$0xff] }
 0x3fa   :  { %v4227_v27 = vadd.f32 %v589_v26, %v377_v13  ;;  %v549_v28 = vpop.f32.mrb[3].mxu1  ;;  %v3308_v29 = vpop.f32.mrb[7].mxu0  ;;  %v601_v34 = vpack.c.bf16 %v544_v31, %v544_v31  ;;  %v548_v35 = vadd.f32 %v547_v25, %v369_v23  ;;  %v625_v49 = vpack.c.bf16 %v4245_v46, %v4245_v46 }
 0x3fb   :  { %v613_v30 = vpack.c.bf16 %v546_v24, %v546_v24  ;;  %606 = vrot.lane.b32.xlu1 %v546_v24, %s3894_s29  ;;  %v550_v33 = vadd.f32 %v549_v28, %v373_v18 }
 0x3fc   :  { %v603_v45 = vpack.c.bf16 %v548_v35, %v548_v35  ;;  %v876_v51 = vsel %vm874_vm5, %v625_v49, 0 }
 0x3fd   :  { %v634_v32 = vsel %vm629_vm4, %v613_v30, 0  ;;  %v615_v40 = vpack.c.bf16 %v550_v33, %v550_v33 }
 0x3fe   :  { %3310 = vmatpush3.bf16.xpose.msra.mxu1 %v634_v32 }
 0x3ff   :  { %594 = vrot.lane.b32.xlu1 %v544_v31, %s3894_s29  ;;  %3315 = vmatprep.subr.bf16.mxu1 %v3909_v2  ;;  %v726_v42 = vsel %vm629_vm4, %v615_v40, 0 }
 0x403   :  { %610 = vrot.lane.b32.xlu1 %v550_v33, %s3894_s29 }
 0x405   :  { %3312 = vmatmul.mubr.msk.bf16.vlgmr.msra.gmra.mrb[4].mxu1 %vm629_vm4, %v601_v34 }
 0x406   :  { %3317 = vmatprep.mubr.msk.bf16.mxu1 %vm3910_vm0, %v3909_v2 }
 0x407   :  { %598 = vrot.lane.b32.xlu1 %v548_v35, %s3894_s29 }
 0x46d   :  { %v607_v36 = vpop.permute.xlu1 %606 }
 0x46e   :  { %v614_v37 = vpack.c.bf16 %v607_v36, %v607_v36 }
 0x470   :  { %v680_v38 = vsel %vm629_vm4, %v614_v37, 0 }
 0x471   :  { %3316 = vmatpush3.bf16.xpose.msra.mxu1 %v680_v38  ;;  %v595_v39 = vpop.permute.xlu1 %594 }
 0x472   :  { %3321 = vmatprep.subr.bf16.mxu1 %v3909_v2  ;;  %v602_v41 = vpack.c.bf16 %v595_v39, %v595_v39 }
 0x475   :  { %v611_v43 = vpop.permute.xlu1 %610 }
 0x476   :  { %v616_v44 = vpack.c.bf16 %v611_v43, %v611_v43 }
 0x478   :  { %3318 = vmatmul.mubr.msk.bf16.vlgmr.msra.gmra.mrb[8].mxu1 %vm629_vm4, %v602_v41  ;;  %v772_v47 = vsel %vm629_vm4, %v616_v44, 0 }
 0x479   :  { %3322 = vmatpush3.bf16.xpose.msra.mxu1 %v726_v42  ;;  %3323 = vmatprep.mubr.msk.bf16.mxu1 %vm3910_vm0, %v3909_v2  ;;  %v599_v48 = vpop.permute.xlu1 %598 }
 0x47a   :  { %3327 = vmatprep.subr.bf16.mxu1 %v3909_v2  ;;  %v604_v50 = vpack.c.bf16 %v599_v48, %v599_v48 }
 0x480   :  { %3324 = vmatmul.mubr.msk.bf16.vlgmr.msra.gmra.mrb[12].mxu1 %vm629_vm4, %v603_v45 }
 0x481   :  { %3328 = vmatpush3.bf16.xpose.msra.mxu1 %v772_v47  ;;  %3329 = vmatprep.mubr.msk.bf16.mxu1 %vm3910_vm0, %v3909_v2 }
 0x482   :  { %3333 = vmatprep.subr.bf16.mxu1 %v3909_v2 }
 0x488   :  { %3330 = vmatmul.mubr.msk.bf16.vlgmr.msra.gmra.mrb[16].mxu1 %vm629_vm4, %v604_v50 }
 0x489   :  { %3334 = vmatpush3.bf16.msra.mxu1 %v876_v51  ;;  %3335 = vmatprep.mubr.msk.bf16.mxu1 %vm3910_vm0, %v3909_v2 }
 0x48a   :  { %3339 = vmatprep.subr.bf16.mxu1 %v3909_v2 }
 0x4d8   :  { %v670_v52 = vpop.f32.mrb[4].mxu1 }
 0x4d9   :  { %v814_v54 = vmul.f32 0.125, %v670_v52  ;;  %v3313_v55 = vpop.f32.mrb[5].mxu1 }
 0x4da   :  { %v673_v56 = vpop.f32.mrb[6].mxu1 }
 0x4db   :  { %v3314_v57 = vpop.f32.mrb[7].mxu1  ;;  %v818_v58 = vadd.f32 %v814_v54, %v4262_v53 }
 0x4dd   :  { %v823_v59 = vsel %vm822_vm6, %v818_v58, -inf }
 0x4de   :  { %824 = vmax.xlane.f32.xlu0 %v823_v59 }
 0x54b   :  { %v716_v60 = vpop.f32.mrb[8].mxu1 }
 0x54c   :  { %v815_v62 = vmul.f32 0.125, %v716_v60  ;;  %v3319_v63 = vpop.f32.mrb[9].mxu1 }
 0x54d   :  { %v719_v0 = vpop.f32.mrb[10].mxu1  ;;  %v627_v63 = vpack.c.bf16 %v4227_v27, %v4227_v27 }
 0x54e   :  { %v3320_v3 = vpop.f32.mrb[11].mxu1  ;;  %v819_v4 = vadd.f32 %v815_v62, %v4269_v61 }
 0x550   :  { %v826_v5 = vsel %vm822_vm6, %v819_v4, -inf }
 0x551   :  { %827 = vmax.xlane.f32.xlu1 %v826_v5 }
 0x553   :  { %v762_v6 = vpop.f32.mrb[12].mxu1 }
 0x554   :  { %v816_v8 = vmul.f32 0.125, %v762_v6  ;;  %v3325_v11 = vpop.f32.mrb[13].mxu1 }
 0x555   :  { %v765_v15 = vpop.f32.mrb[14].mxu1 }
 0x556   :  { %v3326_v18 = vpop.f32.mrb[15].mxu1  ;;  %v820_v19 = vadd.f32 %v816_v8, %v4276_v7 }
 0x558   :  { %v829_v20 = vsel %vm822_vm6, %v820_v19, -inf }
 0x559   :  { %830 = vmax.xlane.f32.xlu0 %v829_v20 }
 0x55b   :  { %v808_v13 = vpop.f32.mrb[16].mxu1 }
 0x55c   :  { %v817_v22 = vmul.f32 0.125, %v808_v13  ;;  %v3331_v23 = vpop.f32.mrb[17].mxu1 }
 0x55d   :  { %v811_v24 = vpop.f32.mrb[18].mxu1 }
 0x55e   :  { %v3332_v25 = vpop.f32.mrb[19].mxu1  ;;  %v821_v26 = vadd.f32 %v817_v22, %v4283_v21  ;;  %v3535_v24 = vld [vmem:[#allocation5] sm:$0xff]  }
 0x55f   :  { %3358 = vmatpush3.bf16.msra.mxu0 %v3535_v24  ;;  %v3536_v25 = vld [vmem:[#allocation5 + $0x8] sm:$0xff]   ;;  %v3560_v24 = vld [vmem:[#allocation10 + $0x54] ss:$8 sps:$4 sm:$0xff]  }
 0x560   :  { %v832_v28 = vsel %vm822_vm6, %v821_v26, -inf  ;;  %3359 = vmatprep.subr.bf16.mxu0 %v3909_v2 }
 0x561   :  { %833 = vmax.xlane.f32.xlu0 %v832_v28  ;;  %v3538_v28 = vld [vmem:[#allocation5 + $0x18] sm:$0xff]  }
 0x562   :  { %622 = vrot.lane.b32.xlu1 %v4227_v27, %s3894_s29 }
 0x563   :  { %3360 = vmatpush3.bf16.msra.mxu0 %v3536_v25  ;;  %v3558_v25 = vld [vmem:[#allocation10 + $0x50] ss:$8 sps:$4 sm:$0xff]  }
 0x564   :  { %3361 = vmatprep.subr.bf16.mxu0 %v3909_v2 }
 0x56b   :  { %v825_v29 = vpop.xlane.xlu0 %824 }
 0x56c   :  { %v835_v30 = vsub.f32 %v818_v58, %v825_v29  ;;  %v3539_v29 = vld [vmem:[#allocation5 + $0x20] sm:$0xff]  }
 0x56e   :  { %v839_v31 = vmul.f32 1.442695, %v835_v30  ;;  %v3540_v30 = vld [vmem:[#allocation5 + $0x28] sm:$0xff]  }
 0x570   :  { %3667 = vpow2.f32 %v839_v31  ;;  %v3541_v31 = vld [vmem:[#allocation5 + $0x30] sm:$0xff]  }
 0x57a   :  { %v3668_v32 = vpop.eup %3667 }
 0x57b   :  { %v847_v33 = vsel %vm822_vm6, %v3668_v32, 0.0 }
 0x57c   :  { %848 = vadd.xlane.f32.xlu0 %v847_v33 }
 0x5de   :  { %v828_v34 = vpop.xlane.xlu1 %827 }
 0x5df   :  { %v836_v35 = vsub.f32 %v819_v4, %v828_v34  ;;  %v968_v4 = vsel %vm874_vm5, %v627_v63, 0 }
 0x5e1   :  { %v841_v36 = vmul.f32 1.442695, %v836_v35 }
 0x5e2   :  { %v623_v5 = vpop.permute.xlu1 %622 }
 0x5e3   :  { %3669 = vpow2.f32 %v841_v36  ;;  %v628_v27 = vpack.c.bf16 %v623_v5, %v623_v5  ;;  %v3542_v36 = vld [vmem:[#allocation5 + $0x38] sm:$0xff]  }
 0x5e5   :  { %v1014_v15 = vsel %vm874_vm5, %v628_v27, 0 }
 0x5e6   :  { %v831_v37 = vpop.xlane.xlu0 %830 }
 0x5e7   :  { %v837_v38 = vsub.f32 %v820_v19, %v831_v37 }
 0x5e9   :  { %v843_v39 = vmul.f32 1.442695, %v837_v38 }
 0x5eb   :  { %3671 = vpow2.f32 %v843_v39 }
 0x5ed   :  { %v3670_v40 = vpop.eup %3669 }
 0x5ee   :  { %v834_v41 = vpop.xlane.xlu0 %833  ;;  %v850_v42 = vsel %vm822_vm6, %v3670_v40, 0.0 }
 0x5ef   :  { %v838_v43 = vsub.f32 %v821_v26, %v834_v41  ;;  %851 = vadd.xlane.f32.xlu0 %v850_v42  ;;  %v3537_v26 = vld [vmem:[#allocation5 + $0x10] sm:$0xff]  }
 0x5f0   :  { %3362 = vmatpush3.bf16.msra.mxu0 %v3537_v26  ;;  %v3563_v26 = vld [vmem:[#allocation10 + $0x64] ss:$8 sps:$4 sm:$0xff]  }
 0x5f1   :  { %v845_v44 = vmul.f32 1.442695, %v838_v43  ;;  %3363 = vmatprep.subr.bf16.mxu0 %v3909_v2 }
 0x5f3   :  { %3673 = vpow2.f32 %v845_v44 }
 0x5f4   :  { %3364 = vmatpush3.bf16.msra.mxu0 %v3538_v28  ;;  %v3561_v28 = vld [vmem:[#allocation10 + $0x60] ss:$8 sps:$4 sm:$0xff]  }
 0x5f5   :  { %v3672_v45 = vpop.eup %3671  ;;  %3365 = vmatprep.subr.bf16.mxu0 %v3909_v2 }
 0x5f6   :  { %v853_v47 = vsel %vm822_vm6, %v3672_v45, 0.0 }
 0x5f7   :  { %854 = vadd.xlane.f32.xlu0 %v853_v47 }
 0x5f8   :  { %3366 = vmatpush3.bf16.msra.mxu0 %v3539_v29  ;;  %v3566_v29 = vld [vmem:[#allocation10 + $0x74] ss:$8 sps:$4 sm:$0xff]  }
 0x5f9   :  { %3367 = vmatprep.subr.bf16.mxu0 %v3909_v2 }
 0x5fc   :  { %3368 = vmatpush3.bf16.msra.mxu0 %v3540_v30  ;;  %v3564_v30 = vld [vmem:[#allocation10 + $0x70] ss:$8 sps:$4 sm:$0xff]  }
 0x5fd   :  { %v3674_v48 = vpop.eup %3673  ;;  %3369 = vmatprep.subr.bf16.mxu0 %v3909_v2 }
 0x5fe   :  { %v856_v49 = vsel %vm822_vm6, %v3674_v48, 0.0 }
 0x5ff   :  { %857 = vadd.xlane.f32.xlu0 %v856_v49 }
 0x600   :  { %3370 = vmatpush3.bf16.msra.mxu0 %v3541_v31 }
 0x601   :  { %3371 = vmatprep.subr.bf16.mxu0 %v3909_v2 }
 0x604   :  { %3372 = vmatpush3.bf16.msra.mxu0 %v3542_v36 }
 0x609   :  { %v849_v50 = vpop.xlane.xlu0 %848 }
 0x60a   :  { %3675 = vrcp.f32 %v849_v50 }
 0x614   :  { %v3676_v51 = vpop.eup %3675 }
 0x615   :  { %v863_v52 = vmul.f32 %v3676_v51, %v3668_v32  ;;  %618 = vrot.lane.b32.xlu0 %v4245_v46, %s3894_s29 }
 0x617   :  { %v867_v54 = vpack.c.bf16 %v863_v52, %v863_v52 }
 0x619   :  { %3336 = vmatmul.mubr.msk.bf16.vlgmr.msra.gmra.mrb[20].mxu1 %vm822_vm6, %v867_v54  ;;  %v3017_v54 = vld [vmem:[%s4492_s9] ss:$0 sm:$0xff] }
 0x61a   :  { %3341 = vmatprep.mubr.msk.bf16.mxu1 %vm3910_vm0, %v3909_v2 }
 0x67c   :  { %v852_v55 = vpop.xlane.xlu0 %851 }
 0x67d   :  { %3677 = vrcp.f32 %v852_v55 }
 0x684   :  { %v855_v56 = vpop.xlane.xlu0 %854 }
 0x685   :  { %3679 = vrcp.f32 %v855_v56 }
 0x687   :  { %v3678_v58 = vpop.eup %3677 }
 0x688   :  { %v864_v60 = vmul.f32 %v3678_v58, %v3670_v40 }
 0x68a   :  { %v868_v0 = vpack.c.bf16 %v864_v60, %v864_v60 }
 0x68c   :  { %v858_v57 = vpop.xlane.xlu0 %857 }
 0x68d   :  { %3681 = vrcp.f32 %v858_v57 }
 0x68f   :  { %v3680_v3 = vpop.eup %3679 }
 0x690   :  { %v619_v59 = vpop.permute.xlu0 %618  ;;  %v865_v6 = vmul.f32 %v3680_v3, %v3672_v45  ;;  %v3548_v3 = vld [vmem:[#allocation10 + $0x14] ss:$8 sps:$4 sm:$0xff]  }
 0x691   :  { %v626_v62 = vpack.c.bf16 %v619_v59, %v619_v59 }
 0x692   :  { %v869_v8 = vpack.c.bf16 %v865_v6, %v865_v6 }
 0x693   :  { %v922_v46 = vsel %vm874_vm5, %v626_v62, 0 }
 0x694   :  { %3340 = vmatpush3.bf16.msra.mxu1 %v922_v46  ;;  %v3543_v46 = vld [vmem:[#allocation10] ss:$8 sps:$4 sm:$0xff]  }
 0x695   :  { %3345 = vmatprep.subr.bf16.mxu1 %v3909_v2 }
 0x697   :  { %3342 = vmatmul.mubr.msk.bf16.vlgmr.msra.gmra.mrb[24].mxu1 %vm822_vm6, %v868_v0  ;;  %v3682_v11 = vpop.eup %3681  ;;  %v3545_v0 = vld [vmem:[#allocation10 + $0x4] ss:$8 sps:$4 sm:$0xff]  }
 0x698   :  { %3346 = vmatpush3.bf16.msra.mxu1 %v968_v4  ;;  %3347 = vmatprep.mubr.msk.bf16.mxu1 %vm3910_vm0, %v3909_v2  ;;  %v866_v18 = vmul.f32 %v3682_v11, %v3674_v48  ;;  %v3546_v4 = vld [vmem:[#allocation10 + $0x10] ss:$8 sps:$4 sm:$0xff]  }
 0x699   :  { %3351 = vmatprep.subr.bf16.mxu1 %v3909_v2 }
 0x69a   :  { %v870_v19 = vpack.c.bf16 %v866_v18, %v866_v18 }
 0x69f   :  { %3348 = vmatmul.mubr.msk.bf16.vlgmr.msra.gmra.mrb[28].mxu1 %vm822_vm6, %v869_v8 }
 0x6a0   :  { %3352 = vmatpush3.bf16.msra.mxu1 %v1014_v15  ;;  %3353 = vmatprep.mubr.msk.bf16.mxu1 %vm3910_vm0, %v3909_v2 }
 0x6a1   :  { %1330 = vmatprep.subr.bf16.mxu1 %v3545_v0  ;;  %v3581_v0 = vld [vmem:[#allocation11 + $0x78] sm:$0xff]  }
 0x6a7   :  { %3354 = vmatmul.mubr.msk.bf16.vlgmr.msra.gmra.mrb[32].mxu1 %vm822_vm6, %v870_v19  ;;  %v3549_v19 = vld [vmem:[#allocation10 + $0x20] ss:$8 sps:$4 sm:$0xff]  }
 0x6a8   :  { %1362 = vmatprep.mubr.bf16.mxu1 %v3908_v1  ;;  %1331 = vmatpush1.bf16.msra.mxu1 %v3543_v46  ;;  %v3580_v46 = vld [vmem:[#allocation11 + $0x30] sm:$0xff]  }
 0x6a9   :  { %1332 = vmatprep.subr.bf16.mxu1 %v3548_v3  ;;  %v3582_v3 = vld [vmem:[#allocation11 + $0x38] sm:$0xff]  }
 0x6ac   :  { %1333 = vmatpush1.bf16.msra.mxu1 %v3546_v4  ;;  %v1238_v4 = vld [vmem:[%s4496_s13] sm:$0x3] }
 0x6ec   :  { %v912_v20 = vpop.f32.mrb[20].mxu1 }
 0x6ed   :  { %v3337_v13 = vpop.f32.mrb[21].mxu1 }
 0x6ee   :  { %v915_v22 = vpop.f32.mrb[22].mxu1  ;;  %v3552_v13 = vld [vmem:[#allocation10 + $0x30] ss:$8 sps:$4 sm:$0xff]  }
 0x6ef   :  { %v3338_v23 = vpop.f32.mrb[23].mxu1  ;;  %v3557_v22 = vld [vmem:[#allocation10 + $0x44] ss:$8 sps:$4 sm:$0xff]  }
 0x6f0   :  { %v3555_v23 = vld [vmem:[#allocation10 + $0x40] ss:$8 sps:$4 sm:$0xff]  }
 0x76a   :  { %v958_v32 = vpop.f32.mrb[24].mxu1 }
 0x76b   :  { %v3343_v33 = vpop.f32.mrb[25].mxu1 }
 0x76c   :  { %v961_v34 = vpop.f32.mrb[26].mxu1 }
 0x76d   :  { %v3344_v35 = vpop.f32.mrb[27].mxu1 }
 0x772   :  { %v1004_v37 = vpop.f32.mrb[28].mxu1 }
 0x773   :  { %v3349_v38 = vpop.f32.mrb[29].mxu1 }
 0x774   :  { %v1007_v39 = vpop.f32.mrb[30].mxu1 }
 0x775   :  { %v3350_v40 = vpop.f32.mrb[31].mxu1  ;;  %v3026_v39 = vld [vmem:[#allocation7] ss:$0 sm:$0xff] }
 0x77a   :  { %v1050_v41 = vpop.f32.mrb[32].mxu1 }
 0x77b   :  { %v3485_v42 = vpack.i.bf16 %v1050_v41, %v958_v32  ;;  %v3355_v43 = vpop.f32.mrb[33].mxu1 }
 0x77c   :  { %v1053_v44 = vpop.f32.mrb[34].mxu1  ;;  %v3027_v43 = vld [vmem:[#allocation8] ss:$0 sm:$0xff] }
 0x77d   :  { %3486 = vrot.lane.b32.xlu0 %v3485_v42, %s3894_s29  ;;  %v3356_v45 = vpop.f32.mrb[35].mxu1 }
 0x7ef   :  { %v3487_v47 = vpop.permute.xlu0 %3486 }
 0x7f0   :  { %v3489_v48 = vunpack.i.h.bf16 %v3487_v47  ;;  %v3488_v49 = vunpack.i.l.bf16 %v3487_v47 }
 0x7f2   :  { %v1065_v50 = vsel %vm629_vm4, %v1004_v37, %v3489_v48  ;;  %v1060_v51 = vsel %vm629_vm4, %v912_v20, %v3488_v49  ;;  %v3554_v20 = vld [vmem:[#allocation10 + $0x34] ss:$8 sps:$4 sm:$0xff]   ;;  %v3567_v49 = vld [vmem:[#allocation11 + $0x40] sm:$0xff]  }
 0x7f3   :  { %v1066_v52 = vpack.c.bf16 %v1065_v50, %v1060_v51  ;;  %v3568_v50 = vld [vmem:[#allocation11] sm:$0xff]   ;;  %3191 = vmatprep.subr.bf16.mxu0 %v3567_v49  ;;  %v3569_v51 = vld [vmem:[#allocation11 + $0x48] sm:$0xff]  }
 0x7f5   :  { %3374 = vmatmul.mubr.bf16.vlgmr.msra.gmra.mrb[8].mxu0 %v1066_v52  ;;  %v3570_v52 = vld [vmem:[#allocation11 + $0x8] sm:$0xff]  }
 0x7f6   :  { %3192 = vmatpush3.bf16.msra.mxu0 %v3568_v50 }
 0x7f7   :  { %3193 = vmatprep.subr.bf16.mxu0 %v3569_v51 }
 0x7fa   :  { %3194 = vmatpush3.bf16.msra.mxu0 %v3570_v52 }
 0x8c8   :  { %v1172_v55 = vpop.f32.mrb[8].mxu0 }
 0x8c9   :  { %v1173_v56 = vadd.f32 %v3017_v54, %v1172_v55  ;;  %v3375_v57 = vpop.f32.mrb[9].mxu0  ;;  %v3572_v55 = vld [vmem:[#allocation11 + $0x10] sm:$0xff]  }
 0x8ca   :  { %v1175_v58 = vpop.f32.mrb[10].mxu0  ;;  %v3574_v57 = vld [vmem:[#allocation11 + $0x18] sm:$0xff]  }
 0x8cb   :  { %v1176_v59 = vadd.f32 %v3017_v54, %v1175_v58  ;;  %v3376_v60 = vpop.f32.mrb[11].mxu0  ;;  %v1179_v62 = vadd.f32 %v1173_v56, %v4200_v9  ;;  %v3571_v54 = vld [vmem:[#allocation11 + $0x50] sm:$0xff]   ;;  %v3573_v56 = vld [vmem:[#allocation11 + $0x58] sm:$0xff]   ;;  %v3575_v58 = vld [vmem:[#allocation11 + $0x60] sm:$0xff]  }
 0x8cc   :  { %3195 = vmatprep.subr.bf16.mxu0 %v3571_v54  ;;  %v3577_v60 = vld [vmem:[#allocation11 + $0x68] sm:$0xff]  }
 0x8cd   :  { %1183 = vadd.xlane.f32.xlu0 %v1179_v62  ;;  %v1180_v63 = vadd.f32 %v1176_v59, %v4202_v10  ;;  %v3551_v10 = vld [vmem:[#allocation10 + $0x24] ss:$8 sps:$4 sm:$0xff]   ;;  %3196 = vmatpush3.bf16.msra.mxu0 %v3572_v55 }
 0x8ce   :  { %1334 = vmatprep.subr.bf16.mxu1 %v3551_v10  ;;  %3197 = vmatprep.subr.bf16.mxu0 %v3573_v56  ;;  %v3576_v59 = vld [vmem:[#allocation11 + $0x20] sm:$0xff]  }
 0x8cf   :  { %1185 = vadd.xlane.f32.xlu1 %v1180_v63  ;;  %1335 = vmatpush1.bf16.msra.mxu1 %v3549_v19 }
 0x8d0   :  { %1336 = vmatprep.subr.bf16.mxu1 %v3554_v20 }
 0x8d1   :  { %3198 = vmatpush3.bf16.msra.mxu0 %v3574_v57 }
 0x8d2   :  { %3199 = vmatprep.subr.bf16.mxu0 %v3575_v58 }
 0x8d3   :  { %1337 = vmatpush1.bf16.msra.mxu1 %v3552_v13 }
 0x8d4   :  { %1338 = vmatprep.subr.bf16.mxu1 %v3557_v22 }
 0x8d5   :  { %3200 = vmatpush3.bf16.msra.mxu0 %v3576_v59 }
 0x8d6   :  { %3201 = vmatprep.subr.bf16.mxu0 %v3577_v60 }
 0x8d7   :  { %1339 = vmatpush1.bf16.msra.mxu1 %v3555_v23 }
 0x8d8   :  { %1340 = vmatprep.subr.bf16.mxu1 %v3560_v24 }
 0x8db   :  { %1341 = vmatpush1.bf16.msra.mxu1 %v3558_v25 }
 0x8dc   :  { %1342 = vmatprep.subr.bf16.mxu1 %v3563_v26 }
 0x8df   :  { %1343 = vmatpush1.bf16.msra.mxu1 %v3561_v28 }
 0x8e0   :  { %1344 = vmatprep.subr.bf16.mxu1 %v3566_v29 }
 0x8e3   :  { %1345 = vmatpush1.bf16.msra.mxu1 %v3564_v30 }
 0x95a   :  { %v1184_v5 = vpop.xlane.xlu0 %1183 }
 0x95b   :  { %v1187_v6 = vmul.f32 0.0078125, %v1184_v5  ;;  %v1243_v5 = vrot.slane %v1238_v4, %v4221_v17 }
 0x95c   :  { %v1186_v27 = vpop.xlane.xlu1 %1185 }
 0x95d   :  { %v1189_v8 = vsub.f32 %v1179_v62, %v1187_v6  ;;  %v1188_v11 = vmul.f32 0.0078125, %v1186_v27  ;;  %v3578_v62 = vld [vmem:[#allocation11 + $0x28] sm:$0xff]   ;;  %v1247_v6 = vrot.slane %v1238_v4, %v4214_v14 }
 0x95e   :  { %3202 = vmatpush3.bf16.msra.mxu0 %v3578_v62 }
 0x95f   :  { %v1190_v15 = vsub.f32 %v1180_v63, %v1188_v11  ;;  %v1191_v18 = vmul.f32 %v1189_v8, %v1189_v8  ;;  %v3579_v63 = vld [vmem:[#allocation11 + $0x70] sm:$0xff]  }
 0x960   :  { %3203 = vmatprep.subr.bf16.mxu0 %v3579_v63 }
 0x961   :  { %1193 = vadd.xlane.f32.xlu0 %v1191_v18  ;;  %v1192_v9 = vmul.f32 %v1190_v15, %v1190_v15 }
 0x962   :  { %3204 = vmatpush3.bf16.msra.mxu0 %v3580_v46 }
 0x963   :  { %3205 = vmatprep.subr.bf16.mxu0 %v3581_v0  ;;  %v3044_v0 = vld [vmem:[%s4498_s15] ss:$0 sm:$0xff] }
 0x965   :  { %1195 = vadd.xlane.f32.xlu0 %v1192_v9 }
 0x966   :  { %3206 = vmatpush3.bf16.msra.mxu0 %v3582_v3 }
 0x967   :  { %3377 = vmatprep.subr.bf16.mxu0 %v3909_v2 }
 0x9ee   :  { %v1194_v31 = vpop.xlane.xlu0 %1193 }
 0x9ef   :  { %v1197_v32 = vmul.f32 0.0078125, %v1194_v31 }
 0x9f1   :  { %v1199_v33 = vadd.f32 1e-12, %v1197_v32 }
 0x9f2   :  { %v1196_v34 = vpop.xlane.xlu0 %1195 }
 0x9f3   :  { %3683 = vrsqrt.f32 %v1199_v33  ;;  %v1198_v35 = vmul.f32 0.0078125, %v1196_v34 }
 0x9f5   :  { %v1200_v36 = vadd.f32 1e-12, %v1198_v35 }
 0x9f7   :  { %3685 = vrsqrt.f32 %v1200_v36 }
 0x9fd   :  { %v3684_v37 = vpop.eup %3683 }
 0x9fe   :  { %v1203_v38 = vmul.f32 %v3684_v37, %v1189_v8 }
 0xa00   :  { %v1211_v42 = vmul.f32 %v3026_v39, %v1203_v38 }
 0xa01   :  { %v3686_v40 = vpop.eup %3685 }
 0xa02   :  { %v1204_v41 = vmul.f32 %v3686_v40, %v1190_v15  ;;  %v4328_v45 = vadd.f32 %v3027_v43, %v1211_v42 }
 0xa04   :  { %v1212_v44 = vmul.f32 %v3026_v39, %v1204_v41 }
 0xa06   :  { %v4330_v47 = vadd.f32 %v3027_v43, %v1212_v44 }
 0xa08   :  { %v1221_v48 = vpack.c.bf16 %v4330_v47, %v4328_v45 }
 0xa0a   :  { %1363 = vmatmul.mubr.bf16.vlgmr.msra.gmra.mrb[36].mxu1 %v1221_v48 }
 0xa0b   :  { %1841 = vmatprep.mubr.bf16.mxu1 %v3908_v1 }
 0xadd   :  { %v1364_v27 = vpop.f32.mrb[36].mxu1 }
 0xade   :  { %v1365_v8 = vadd.f32 %v1364_v27, %v1243_v5  ;;  %v1366_v11 = vpop.f32.mrb[37].mxu1 }
 0xadf   :  { %v1367_v15 = vadd.f32 %v1366_v11, %v1247_v6  ;;  %v1368_v18 = vpop.f32.mrb[38].mxu1 }
 0xae0   :  { %v1377_v9 = vmul.f32 0.044715, %v1365_v8  ;;  %v1369_v10 = vadd.f32 %v1368_v18, %v1243_v5  ;;  %v1370_v19 = vpop.f32.mrb[39].mxu1  ;;  %v1373_v50 = vmul.f32 0.5, %v1365_v8 }
 0xae1   :  { %v1378_v20 = vmul.f32 0.044715, %v1367_v15  ;;  %v1371_v13 = vadd.f32 %v1370_v19, %v1247_v6  ;;  %v1374_v54 = vmul.f32 0.5, %v1367_v15  ;;  %v3586_v19 = vld [vmem:[#allocation3 + $0xc8] ss:$12 sps:$4 sm:$0xff]  }
 0xae2   :  { %v1381_v22 = vmul.f32 %v1377_v9, %v1365_v8  ;;  %v1379_v23 = vmul.f32 0.044715, %v1369_v10  ;;  %v1375_v51 = vmul.f32 0.5, %v1369_v10  ;;  %v3583_v9 = vld [vmem:[#allocation3 + $0xc0] ss:$12 sps:$4 sm:$0xff]  }
 0xae3   :  { %v1382_v24 = vmul.f32 %v1378_v20, %v1367_v15  ;;  %v1380_v25 = vmul.f32 0.044715, %v1371_v13  ;;  %v1376_v55 = vmul.f32 0.5, %v1371_v13  ;;  %v3589_v20 = vld [vmem:[#allocation3 + $0xdc] ss:$12 sps:$4 sm:$0xff]  }
 0xae4   :  { %v1385_v26 = vmul.f32 %v1381_v22, %v1365_v8  ;;  %v1383_v28 = vmul.f32 %v1379_v23, %v1369_v10  ;;  %v3587_v22 = vld [vmem:[#allocation3 + $0xd8] ss:$12 sps:$4 sm:$0xff]  }
 0xae5   :  { %v1386_v29 = vmul.f32 %v1382_v24, %v1367_v15  ;;  %v1384_v30 = vmul.f32 %v1380_v25, %v1371_v13 }
 0xae6   :  { %v1389_v31 = vadd.f32 %v1385_v26, %v1365_v8  ;;  %v1387_v32 = vmul.f32 %v1383_v28, %v1369_v10 }
 0xae7   :  { %v1388_v33 = vmul.f32 %v1384_v30, %v1371_v13  ;;  %v1390_v34 = vadd.f32 %v1386_v29, %v1367_v15  ;;  %v3593_v30 = vld [vmem:[#allocation3 + $0xf4] ss:$12 sps:$4 sm:$0xff]  }
 0xae8   :  { %v1393_v35 = vmul.f32 0.7978846, %v1389_v31  ;;  %v1391_v36 = vadd.f32 %v1387_v32, %v1369_v10  ;;  %v3585_v10 = vld [vmem:[#allocation3 + $0xc4] ss:$12 sps:$4 sm:$0xff]  }
 0xae9   :  { %v1392_v37 = vadd.f32 %v1388_v33, %v1371_v13  ;;  %v1394_v38 = vmul.f32 0.7978846, %v1390_v34  ;;  %1809 = vmatprep.subr.bf16.mxu1 %v3585_v10  ;;  %v3590_v13 = vld [vmem:[#allocation3 + $0xe0] ss:$12 sps:$4 sm:$0xff]   ;;  %v3591_v31 = vld [vmem:[#allocation3 + $0xf0] ss:$12 sps:$4 sm:$0xff]  }
 0xaea   :  { %3687 = vtanh.f32 %v1393_v35  ;;  %v1395_v39 = vmul.f32 0.7978846, %v1391_v36  ;;  %1810 = vmatpush1.bf16.msra.mxu1 %v3583_v9  ;;  %v3594_v32 = vld [vmem:[#allocation3 + $0xf8] ss:$12 sps:$4 sm:$0xff]   ;;  %v3595_v34 = vld [vmem:[#allocation3 + $0x108] ss:$12 sps:$4 sm:$0xff]  }
 0xaeb   :  { %v1396_v40 = vmul.f32 0.7978846, %v1392_v37  ;;  %3689 = vtanh.f32 %v1394_v38  ;;  %1811 = vmatprep.subr.bf16.mxu1 %v3589_v20  ;;  %v3597_v33 = vld [vmem:[#allocation3 + $0x10c] ss:$12 sps:$4 sm:$0xff]   ;;  %v3598_v35 = vld [vmem:[#allocation3 + $0x110] ss:$12 sps:$4 sm:$0xff]  }
 0xaec   :  { %3691 = vtanh.f32 %v1395_v39  ;;  %v3601_v36 = vld [vmem:[#allocation3 + $0x124] ss:$12 sps:$4 sm:$0xff]   ;;  %v3599_v37 = vld [vmem:[#allocation3 + $0x120] ss:$12 sps:$4 sm:$0xff]   ;;  %v3602_v38 = vld [vmem:[#allocation3 + $0x128] ss:$12 sps:$4 sm:$0xff]  }
 0xaed   :  { %3693 = vtanh.f32 %v1396_v40  ;;  %v3605_v39 = vld [vmem:[#allocation3 + $0x13c] ss:$12 sps:$4 sm:$0xff]   ;;  %v3603_v40 = vld [vmem:[#allocation3 + $0x138] ss:$12 sps:$4 sm:$0xff]  }
 0xaee   :  { %1812 = vmatpush1.bf16.msra.mxu1 %v3587_v22 }
 0xaef   :  { %1813 = vmatprep.subr.bf16.mxu1 %v3593_v30 }
 0xaf2   :  { %1814 = vmatpush1.bf16.msra.mxu1 %v3591_v31 }
 0xaf3   :  { %1815 = vmatprep.subr.bf16.mxu1 %v3597_v33 }
 0xaf4   :  { %v3688_v41 = vpop.eup %3687 }
 0xaf5   :  { %v3690_v42 = vpop.eup %3689  ;;  %v1401_v43 = vadd.f32 1.0, %v3688_v41  ;;  %v3606_v41 = vld [vmem:[#allocation3 + $0x140] ss:$12 sps:$4 sm:$0xff]  }
 0xaf6   :  { %v3692_v44 = vpop.eup %3691  ;;  %v1402_v48 = vadd.f32 1.0, %v3690_v42  ;;  %1816 = vmatpush1.bf16.msra.mxu1 %v3595_v34  ;;  %v3609_v42 = vld [vmem:[#allocation3 + $0x154] ss:$12 sps:$4 sm:$0xff]  }
 0xaf7   :  { %v3694_v49 = vpop.eup %3693  ;;  %v1403_v52 = vadd.f32 1.0, %v3692_v44  ;;  %v1405_v57 = vmul.f32 %v1401_v43, %v1373_v50  ;;  %1817 = vmatprep.subr.bf16.mxu1 %v3601_v36  ;;  %v3607_v43 = vld [vmem:[#allocation3 + $0x150] ss:$12 sps:$4 sm:$0xff]   ;;  %v3610_v44 = vld [vmem:[#allocation3 + $0x158] ss:$12 sps:$4 sm:$0xff]  }
 0xaf8   :  { %v1404_v56 = vadd.f32 1.0, %v3694_v49  ;;  %v1406_v59 = vmul.f32 %v1402_v48, %v1374_v54  ;;  %v3613_v48 = vld [vmem:[#allocation3 + $0x16c] ss:$12 sps:$4 sm:$0xff]   ;;  %v3611_v49 = vld [vmem:[#allocation3 + $0x168] ss:$12 sps:$4 sm:$0xff]  }
 0xaf9   :  { %v1407_v58 = vmul.f32 %v1403_v52, %v1375_v51  ;;  %v3614_v50 = vld [vmem:[#allocation3 + $0x170] ss:$12 sps:$4 sm:$0xff]  }
 0xafa   :  { %v1408_v60 = vmul.f32 %v1404_v56, %v1376_v55  ;;  %1818 = vmatpush1.bf16.msra.mxu1 %v3599_v37 }
 0xafb   :  { %v1409_v62 = vpack.c.bf16 %v1407_v58, %v1405_v57  ;;  %1819 = vmatprep.subr.bf16.mxu1 %v3605_v39 }
 0xafc   :  { %v1410_v63 = vpack.c.bf16 %v1408_v60, %v1406_v59  ;;  %v3061_v59 = vld [vmem:[#allocation13] ss:$0 sm:$0xff] }
 0xafe   :  { %1578 = vmatprep.mubr.bf16.mxu0 %v1410_v63  ;;  %1820 = vmatpush1.bf16.msra.mxu1 %v3603_v40 }
 0xaff   :  { %1579 = vmatmul.mubr.bf16.vlgmr.msra.gmra.mrb[12].mxu0 %v1409_v62  ;;  %1821 = vmatprep.subr.bf16.mxu1 %v3609_v42 }
 0xb00   :  { %3393 = vmatprep.mubr.msk.bf16.mxu0 %vm3910_vm0, %v3909_v2  ;;  %3378 = vmatpush3.bf16.msra.mxu0 %v3586_v19 }
 0xb01   :  { %3379 = vmatprep.subr.bf16.mxu0 %v3909_v2 }
 0xb02   :  { %1822 = vmatpush1.bf16.msra.mxu1 %v3607_v43 }
 0xb03   :  { %1823 = vmatprep.subr.bf16.mxu1 %v3613_v48 }
 0xb04   :  { %3380 = vmatpush3.bf16.msra.mxu0 %v3590_v13 }
 0xb05   :  { %3381 = vmatprep.subr.bf16.mxu0 %v3909_v2 }
 0xb06   :  { %1824 = vmatpush1.bf16.msra.mxu1 %v3611_v49 }
 0xb07   :  { %3397 = vmatprep.subr.bf16.mxu1 %v3909_v2 }
 0xb08   :  { %3382 = vmatpush3.bf16.msra.mxu0 %v3594_v32 }
 0xb09   :  { %3383 = vmatprep.subr.bf16.mxu0 %v3909_v2 }
 0xb0c   :  { %3384 = vmatpush3.bf16.msra.mxu0 %v3598_v35 }
 0xb0d   :  { %3385 = vmatprep.subr.bf16.mxu0 %v3909_v2 }
 0xb10   :  { %3386 = vmatpush3.bf16.msra.mxu0 %v3602_v38 }
 0xb11   :  { %3387 = vmatprep.subr.bf16.mxu0 %v3909_v2 }
 0xb14   :  { %3388 = vmatpush3.bf16.msra.mxu0 %v3606_v41 }
 0xb15   :  { %3389 = vmatprep.subr.bf16.mxu0 %v3909_v2 }
 0xb18   :  { %3390 = vmatpush3.bf16.msra.mxu0 %v3610_v44 }
 0xb19   :  { %3391 = vmatprep.subr.bf16.mxu0 %v3909_v2 }
 0xb1c   :  { %3392 = vmatpush3.bf16.msra.mxu0 %v3614_v50 }
 0xb1d   :  { %3421 = vmatprep.subr.bf16.mxu0 %v3909_v2 }
 0xbd2   :  { %v3207_v46 = vpop.f32.mrb[12].mxu0 }
 0xbd3   :  { %v3208_v3 = vpop.f32.mrb[13].mxu0 }
 0xbd4   :  { %v3209_v4 = vadd.f32 %v3208_v3, %v3207_v46  ;;  %v3210_v5 = vpop.f32.mrb[14].mxu0 }
 0xbd5   :  { %v3211_v6 = vpop.f32.mrb[15].mxu0 }
 0xbd6   :  { %v1581_v27 = vadd.f32 %v3209_v4, %v3044_v0  ;;  %v3212_v8 = vadd.f32 %v3211_v6, %v3210_v5 }
 0xbd8   :  { %v1584_v11 = vadd.f32 %v3212_v8, %v3044_v0  ;;  %v1587_v15 = vadd.f32 %v1581_v27, %v4328_v45  ;;  %v3062_v0 = vld [vmem:[%s4500_s17] ss:$0 sm:$0xff]  ;;  %v3063_v27 = vld [vmem:[%s4490_s7 + $0x3] sm:$0x7] }
 0xbd9   :  { %v1669_v8 = vrot.slane %v3063_v27, %v4221_v17 }
 0xbda   :  { %1591 = vadd.xlane.f32.xlu1 %v1587_v15  ;;  %v1588_v18 = vadd.f32 %v1584_v11, %v4330_v47  ;;  %v1677_v11 = vrot.slane %v3063_v27, %v376_v16 }
 0xbdc   :  { %1593 = vadd.xlane.f32.xlu0 %v1588_v18 }
 0xc67   :  { %v1592_v45 = vpop.xlane.xlu1 %1591 }
 0xc68   :  { %v1595_v23 = vmul.f32 0.0078125, %v1592_v45 }
 0xc69   :  { %v1594_v47 = vpop.xlane.xlu0 %1593 }
 0xc6a   :  { %v1597_v24 = vsub.f32 %v1587_v15, %v1595_v23  ;;  %v1596_v25 = vmul.f32 0.0078125, %v1594_v47  ;;  %v1673_v15 = vrot.slane %v3063_v27, %v4214_v14 }
 0xc6c   :  { %v1598_v26 = vsub.f32 %v1588_v18, %v1596_v25  ;;  %v1599_v28 = vmul.f32 %v1597_v24, %v1597_v24 }
 0xc6e   :  { %1601 = vadd.xlane.f32.xlu1 %v1599_v28  ;;  %v1600_v29 = vmul.f32 %v1598_v26, %v1598_v26 }
 0xc70   :  { %1603 = vadd.xlane.f32.xlu0 %v1600_v29 }
 0xcfb   :  { %v1602_v51 = vpop.xlane.xlu1 %1601 }
 0xcfc   :  { %v1605_v52 = vmul.f32 0.0078125, %v1602_v51 }
 0xcfd   :  { %v1604_v54 = vpop.xlane.xlu0 %1603 }
 0xcfe   :  { %v1607_v55 = vadd.f32 1e-12, %v1605_v52  ;;  %v1606_v56 = vmul.f32 0.0078125, %v1604_v54 }
 0xd00   :  { %3695 = vrsqrt.f32 %v1607_v55  ;;  %v1608_v57 = vadd.f32 1e-12, %v1606_v56 }
 0xd02   :  { %3697 = vrsqrt.f32 %v1608_v57 }
 0xd0a   :  { %v3696_v58 = vpop.eup %3695 }
 0xd0b   :  { %v1611_v60 = vmul.f32 %v3696_v58, %v1597_v24 }
 0xd0c   :  { %v3698_v62 = vpop.eup %3697 }
 0xd0d   :  { %v1612_v63 = vmul.f32 %v3698_v62, %v1598_v26  ;;  %v1619_v46 = vmul.f32 %v3061_v59, %v1611_v60 }
 0xd0f   :  { %v1620_v3 = vmul.f32 %v3061_v59, %v1612_v63  ;;  %v4360_v4 = vadd.f32 %v3062_v0, %v1619_v46 }
 0xd11   :  { %v4362_v5 = vadd.f32 %v3062_v0, %v1620_v3 }
 0xd13   :  { %v1629_v6 = vpack.c.bf16 %v4362_v5, %v4360_v4 }
 0xd15   :  { %1842 = vmatmul.mubr.bf16.vlgmr.msra.gmra.mrb[40].mxu1 %v1629_v6  ;;  %3394 = vmatmul.mubr.bf16.vlgmr.msra.gmra.mrb[16].mxu0 %v1629_v6 }
 0xd16   :  { %3399 = vmatprep.mubr.msk.bf16.mxu1 %vm3910_vm0, %v3909_v2  ;;  %3423 = vmatprep.mubr.msk.bf16.mxu0 %vm3910_vm0, %v3909_v2 }
 0xde8   :  { %v1843_v18 = vpop.f32.mrb[40].mxu1  ;;  %v1886_v9 = vpop.f32.mrb[16].mxu0 }
 0xde9   :  { %v1844_v10 = vadd.f32 %v1843_v18, %v1669_v8  ;;  %v4377_v19 = vadd.f32 %v1886_v9, %v1677_v11  ;;  %v1845_v20 = vpop.f32.mrb[41].mxu1  ;;  %v3395_v13 = vpop.f32.mrb[17].mxu0 }
 0xdea   :  { %v1846_v22 = vadd.f32 %v1845_v20, %v1673_v15  ;;  %v1847_v45 = vpop.f32.mrb[42].mxu1  ;;  %v1889_v23 = vpop.f32.mrb[18].mxu0 }
 0xdeb   :  { %v1925_v47 = vpack.c.bf16 %v4377_v19, %v4377_v19  ;;  %v4381_v24 = vadd.f32 %v1889_v23, %v1677_v11  ;;  %v1849_v25 = vpop.f32.mrb[43].mxu1  ;;  %v3396_v12 = vpop.f32.mrb[19].mxu0  ;;  %1894 = vrot.lane.b32.xlu0 %v1844_v10, %s3894_s29  ;;  %v1848_v30 = vadd.f32 %v1847_v45, %v1669_v8  ;;  %v1901_v31 = vpack.c.bf16 %v1844_v10, %v1844_v10 }
 0xdec   :  { %v1913_v16 = vpack.c.bf16 %v1846_v22, %v1846_v22  ;;  %1906 = vrot.lane.b32.xlu1 %v1846_v22, %s3894_s29  ;;  %v1850_v28 = vadd.f32 %v1849_v25, %v1673_v15 }
 0xded   :  { %v2173_v26 = vsel %vm874_vm5, %v1925_v47, 0  ;;  %v1903_v41 = vpack.c.bf16 %v1848_v30, %v1848_v30 }
 0xdee   :  { %3422 = vmatpush3.bf16.msra.mxu0 %v2173_v26  ;;  %v1933_v29 = vsel %vm629_vm4, %v1913_v16, 0  ;;  %v1915_v36 = vpack.c.bf16 %v1850_v28, %v1850_v28 }
 0xdef   :  { %3398 = vmatpush3.bf16.xpose.msra.mxu1 %v1933_v29  ;;  %3433 = vmatprep.subr.bf16.mxu0 %v3909_v2 }
 0xdf0   :  { %1910 = vrot.lane.b32.xlu1 %v1850_v28, %s3894_s29  ;;  %3403 = vmatprep.subr.bf16.mxu1 %v3909_v2  ;;  %v2025_v38 = vsel %vm629_vm4, %v1915_v36, 0 }
 0xdf4   :  { %1898 = vrot.lane.b32.xlu1 %v1848_v30, %s3894_s29 }
 0xdf6   :  { %3400 = vmatmul.mubr.msk.bf16.vlgmr.msra.gmra.mrb[44].mxu1 %vm629_vm4, %v1901_v31 }
 0xdf7   :  { %3405 = vmatprep.mubr.msk.bf16.mxu1 %vm3910_vm0, %v3909_v2 }
 0xe5d   :  { %v1895_v35 = vpop.permute.xlu0 %1894 }
 0xe5e   :  { %v1907_v32 = vpop.permute.xlu1 %1906  ;;  %v1902_v37 = vpack.c.bf16 %v1895_v35, %v1895_v35 }
 0xe5f   :  { %v1914_v33 = vpack.c.bf16 %v1907_v32, %v1907_v32 }
 0xe61   :  { %v1979_v34 = vsel %vm629_vm4, %v1914_v33, 0 }
 0xe62   :  { %3404 = vmatpush3.bf16.xpose.msra.mxu1 %v1979_v34  ;;  %v1911_v39 = vpop.permute.xlu1 %1910 }
 0xe63   :  { %3409 = vmatprep.subr.bf16.mxu1 %v3909_v2  ;;  %v1916_v40 = vpack.c.bf16 %v1911_v39, %v1911_v39 }
 0xe65   :  { %v2071_v42 = vsel %vm629_vm4, %v1916_v40, 0 }
 0xe66   :  { %v1899_v43 = vpop.permute.xlu1 %1898 }
 0xe67   :  { %v1904_v44 = vpack.c.bf16 %v1899_v43, %v1899_v43 }
 0xe69   :  { %3406 = vmatmul.mubr.msk.bf16.vlgmr.msra.gmra.mrb[48].mxu1 %vm629_vm4, %v1902_v37 }
 0xe6a   :  { %3410 = vmatpush3.bf16.xpose.msra.mxu1 %v2025_v38  ;;  %3411 = vmatprep.mubr.msk.bf16.mxu1 %vm3910_vm0, %v3909_v2 }
 0xe6b   :  { %3415 = vmatprep.subr.bf16.mxu1 %v3909_v2 }
 0xe71   :  { %3412 = vmatmul.mubr.msk.bf16.vlgmr.msra.gmra.mrb[52].mxu1 %vm629_vm4, %v1903_v41 }
 0xe72   :  { %3416 = vmatpush3.bf16.xpose.msra.mxu1 %v2071_v42  ;;  %3417 = vmatprep.mubr.msk.bf16.mxu1 %vm3910_vm0, %v3909_v2 }
 0xe73   :  { %3427 = vmatprep.subr.bf16.mxu1 %v3909_v2 }
 0xe79   :  { %3418 = vmatmul.mubr.msk.bf16.vlgmr.msra.gmra.mrb[56].mxu1 %vm629_vm4, %v1904_v44 }
 0xe7a   :  { %3429 = vmatprep.mubr.msk.bf16.mxu1 %vm3910_vm0, %v3909_v2 }
 0xec9   :  { %v1969_v48 = vpop.f32.mrb[44].mxu1 }
 0xeca   :  { %v3401_v49 = vpop.f32.mrb[45].mxu1  ;;  %v2113_v54 = vmul.f32 0.125, %v1969_v48 }
 0xecb   :  { %v1972_v50 = vpop.f32.mrb[46].mxu1 }
 0xecc   :  { %v3402_v51 = vpop.f32.mrb[47].mxu1  ;;  %v2117_v62 = vadd.f32 %v2113_v54, %v4262_v53 }
 0xece   :  { %v2121_v3 = vsel %vm822_vm6, %v2117_v62, -inf }
 0xf3c   :  { %v2015_v52 = vpop.f32.mrb[48].mxu1 }
 0xf3d   :  { %v2114_v55 = vmul.f32 0.125, %v2015_v52  ;;  %v3407_v56 = vpop.f32.mrb[49].mxu1 }
 0xf3e   :  { %v2018_v57 = vpop.f32.mrb[50].mxu1  ;;  %v1927_v56 = vpack.c.bf16 %v4381_v24, %v4381_v24 }
 0xf3f   :  { %v3408_v58 = vpop.f32.mrb[51].mxu1  ;;  %v2118_v59 = vadd.f32 %v2114_v55, %v4269_v61 }
 0xf41   :  { %v2124_v60 = vsel %vm822_vm6, %v2118_v59, -inf }
 0xf42   :  { %2125 = vmax.xlane.f32.xlu0 %v2124_v60  ;;  %v2265_v60 = vsel %vm874_vm5, %v1927_v56, 0  ;;  %v3634_v56 = vld [vmem:[#allocation10 + $0xb4] ss:$8 sps:$4 sm:$0xff]  }
 0xf44   :  { %v2061_v63 = vpop.f32.mrb[52].mxu1 }
 0xf45   :  { %v2115_v46 = vmul.f32 0.125, %v2061_v63  ;;  %v3413_v0 = vpop.f32.mrb[53].mxu1 }
 0xf46   :  { %2122 = vmax.xlane.f32.xlu0 %v2121_v3  ;;  %v2064_v6 = vpop.f32.mrb[54].mxu1  ;;  %v3617_v0 = vld [vmem:[#allocation5 + $0x50] sm:$0xff]   ;;  %v3618_v3 = vld [vmem:[#allocation5 + $0x58] sm:$0xff]  }
 0xf47   :  { %v3414_v27 = vpop.f32.mrb[55].mxu1  ;;  %v2119_v8 = vadd.f32 %v2115_v46, %v4276_v7  ;;  %v3616_v46 = vld [vmem:[#allocation5 + $0x48] sm:$0xff]   ;;  %v3619_v6 = vld [vmem:[#allocation5 + $0x60] sm:$0xff]  }
 0xf48   :  { %v3620_v27 = vld [vmem:[#allocation5 + $0x68] sm:$0xff]  }
 0xf49   :  { %v2127_v11 = vsel %vm822_vm6, %v2119_v8, -inf }
 0xf4a   :  { %2128 = vmax.xlane.f32.xlu0 %v2127_v11 }
 0xf4c   :  { %v2107_v15 = vpop.f32.mrb[56].mxu1 }
 0xf4d   :  { %v2116_v61 = vmul.f32 0.125, %v2107_v15  ;;  %v3419_v18 = vpop.f32.mrb[57].mxu1 }
 0xf4e   :  { %v2110_v9 = vpop.f32.mrb[58].mxu1 }
 0xf4f   :  { %v3420_v10 = vpop.f32.mrb[59].mxu1  ;;  %v2120_v53 = vadd.f32 %v2116_v61, %v4283_v21  ;;  %v3622_v9 = vld [vmem:[#allocation5 + $0x78] sm:$0xff]  }
 0xf51   :  { %v2130_v20 = vsel %vm822_vm6, %v2120_v53, -inf }
 0xf52   :  { %2131 = vmax.xlane.f32.xlu1 %v2130_v20 }
 0xfcf   :  { %v2126_v13 = vpop.xlane.xlu0 %2125 }
 0xfd0   :  { %v2134_v22 = vsub.f32 %v2118_v59, %v2126_v13 }
 0xfd2   :  { %v2139_v45 = vmul.f32 1.442695, %v2134_v22 }
 0xfd3   :  { %v2123_v21 = vpop.xlane.xlu0 %2122 }
 0xfd4   :  { %3699 = vpow2.f32 %v2139_v45  ;;  %v2133_v28 = vsub.f32 %v2117_v62, %v2123_v21 }
 0xfd6   :  { %v2137_v29 = vmul.f32 1.442695, %v2133_v28 }
 0xfd7   :  { %v2129_v30 = vpop.xlane.xlu0 %2128 }
 0xfd8   :  { %v2135_v31 = vsub.f32 %v2119_v8, %v2129_v30  ;;  %v3621_v8 = vld [vmem:[#allocation5 + $0x70] sm:$0xff]  }
 0xfda   :  { %v2141_v33 = vmul.f32 1.442695, %v2135_v31 }
 0xfde   :  { %v3700_v23 = vpop.eup %3699 }
 0xfdf   :  { %v2132_v47 = vpop.xlane.xlu1 %2131  ;;  %v2148_v7 = vsel %vm822_vm6, %v3700_v23, 0.0 }
 0xfe0   :  { %v2136_v25 = vsub.f32 %v2120_v53, %v2132_v47  ;;  %2149 = vadd.xlane.f32.xlu1 %v2148_v7 }
 0xfe2   :  { %v2143_v12 = vmul.f32 1.442695, %v2136_v25 }
 0xfe4   :  { %3701 = vpow2.f32 %v2143_v12 }
 0xfe5   :  { %3703 = vpow2.f32 %v2137_v29 }
 0xfe6   :  { %3705 = vpow2.f32 %v2141_v33 }
 0xfee   :  { %v3702_v16 = vpop.eup %3701 }
 0xfef   :  { %v2154_v26 = vsel %vm822_vm6, %v3702_v16, 0.0  ;;  %v3704_v32 = vpop.eup %3703 }
 0xff0   :  { %2155 = vadd.xlane.f32.xlu0 %v2154_v26  ;;  %v2145_v34 = vsel %vm822_vm6, %v3704_v32, 0.0  ;;  %v3706_v35 = vpop.eup %3705 }
 0xff1   :  { %1918 = vrot.lane.b32.xlu1 %v4377_v19, %s3894_s29  ;;  %v2151_v36 = vsel %vm822_vm6, %v3706_v35, 0.0 }
0x1006   :  { %1922 = vrot.lane.b32.xlu0 %v4381_v24, %s3894_s29  ;;  %v3615_v24 = vld [vmem:[#allocation5 + $0x40] sm:$0xff]  }
0x1015   :  { %2146 = vadd.xlane.f32.xlu1 %v2145_v34 }
0x1025   :  { %2152 = vadd.xlane.f32.xlu0 %v2151_v36 }
0x106d   :  { %v2150_v19 = vpop.xlane.xlu1 %2149 }
0x106e   :  { %3707 = vrcp.f32 %v2150_v19 }
0x1071   :  { %v1919_v37 = vpop.permute.xlu1 %1918 }
0x1072   :  { %v1926_v38 = vpack.c.bf16 %v1919_v37, %v1919_v37 }
0x1074   :  { %v2219_v39 = vsel %vm874_vm5, %v1926_v38, 0 }
0x1075   :  { %3428 = vmatpush3.bf16.msra.mxu1 %v2219_v39 }
0x1076   :  { %3439 = vmatprep.subr.bf16.mxu1 %v3909_v2 }
0x1078   :  { %v3708_v40 = vpop.eup %3707 }
0x1079   :  { %v2162_v41 = vmul.f32 %v3708_v40, %v3700_v23  ;;  %v3623_v40 = vld [vmem:[#allocation10 + $0x80] ss:$8 sps:$4 sm:$0xff]  }
0x107b   :  { %v2166_v42 = vpack.c.bf16 %v2162_v41, %v2162_v41  ;;  %v3625_v41 = vld [vmem:[#allocation10 + $0x84] ss:$8 sps:$4 sm:$0xff]  }
0x107d   :  { %v2156_v43 = vpop.xlane.xlu0 %2155  ;;  %3430 = vmatmul.mubr.msk.bf16.vlgmr.msra.gmra.mrb[60].mxu1 %vm822_vm6, %v2166_v42  ;;  %v3628_v42 = vld [vmem:[#allocation10 + $0x94] ss:$8 sps:$4 sm:$0xff]  }
0x107e   :  { %3709 = vrcp.f32 %v2156_v43  ;;  %3441 = vmatprep.mubr.msk.bf16.mxu1 %vm3910_vm0, %v3909_v2  ;;  %v3626_v43 = vld [vmem:[#allocation10 + $0x90] ss:$8 sps:$4 sm:$0xff]  }
0x1081   :  { %v1923_v44 = vpop.permute.xlu0 %1922 }
0x1082   :  { %v1928_v48 = vpack.c.bf16 %v1923_v44, %v1923_v44 }
0x1084   :  { %v2311_v49 = vsel %vm874_vm5, %v1928_v48, 0 }
0x1085   :  { %3440 = vmatpush3.bf16.msra.mxu1 %v2311_v49 }
0x1086   :  { %2633 = vmatprep.subr.bf16.mxu1 %v3625_v41 }
0x1088   :  { %v3710_v50 = vpop.eup %3709 }
0x1089   :  { %v2164_v51 = vmul.f32 %v3710_v50, %v3702_v16 }
0x108b   :  { %v2168_v52 = vpack.c.bf16 %v2164_v51, %v2164_v51 }
0x108d   :  { %3442 = vmatmul.mubr.msk.bf16.vlgmr.msra.gmra.mrb[64].mxu1 %vm822_vm6, %v2168_v52 }
0x108e   :  { %2665 = vmatprep.mubr.bf16.mxu1 %v3908_v1  ;;  %2634 = vmatpush1.bf16.msra.mxu1 %v3623_v40 }
0x108f   :  { %2635 = vmatprep.subr.bf16.mxu1 %v3628_v42 }
0x1092   :  { %2636 = vmatpush1.bf16.msra.mxu1 %v3626_v43 }
0x10a2   :  { %v2147_v54 = vpop.xlane.xlu1 %2146 }
0x10a3   :  { %3711 = vrcp.f32 %v2147_v54 }
0x10ad   :  { %v3712_v55 = vpop.eup %3711 }
0x10ae   :  { %v2161_v57 = vmul.f32 %v3712_v55, %v3704_v32  ;;  %v3097_v32 = vld [vmem:[%s4492_s9 + $0x1] ss:$0 sm:$0xff]  ;;  %v3629_v55 = vld [vmem:[#allocation10 + $0xa0] ss:$8 sps:$4 sm:$0xff]  }
0x10b0   :  { %v2165_v58 = vpack.c.bf16 %v2161_v57, %v2161_v57  ;;  %v3632_v57 = vld [vmem:[#allocation10 + $0xb0] ss:$8 sps:$4 sm:$0xff]  }
0x10b2   :  { %v2153_v59 = vpop.xlane.xlu0 %2152  ;;  %3424 = vmatmul.mubr.msk.bf16.vlgmr.msra.gmra.mrb[20].mxu0 %vm822_vm6, %v2165_v58  ;;  %v3637_v58 = vld [vmem:[#allocation10 + $0xc4] ss:$8 sps:$4 sm:$0xff]  }
0x10b3   :  { %3713 = vrcp.f32 %v2153_v59  ;;  %3434 = vmatpush3.bf16.msra.mxu0 %v2265_v60  ;;  %3435 = vmatprep.mubr.msk.bf16.mxu0 %vm3910_vm0, %v3909_v2  ;;  %v3635_v59 = vld [vmem:[#allocation10 + $0xc0] ss:$8 sps:$4 sm:$0xff]   ;;  %v3640_v60 = vld [vmem:[#allocation10 + $0xd4] ss:$8 sps:$4 sm:$0xff]  }
0x10b4   :  { %3445 = vmatprep.subr.bf16.mxu0 %v3909_v2 }
0x10bd   :  { %v3714_v1 = vpop.eup %3713 }
0x10be   :  { %v2163_v62 = vmul.f32 %v3714_v1, %v3706_v35  ;;  %v3638_v1 = vld [vmem:[#allocation10 + $0xd0] ss:$8 sps:$4 sm:$0xff]  }
0x10c0   :  { %v2167_v63 = vpack.c.bf16 %v2163_v62, %v2163_v62  ;;  %v3643_v62 = vld [vmem:[#allocation10 + $0xe4] ss:$8 sps:$4 sm:$0xff]  }
0x10c2   :  { %3436 = vmatmul.mubr.msk.bf16.vlgmr.msra.gmra.mrb[24].mxu0 %vm822_vm6, %v2167_v63  ;;  %v3641_v63 = vld [vmem:[#allocation10 + $0xe0] ss:$8 sps:$4 sm:$0xff]  }
0x10c3   :  { %3461 = vmatprep.mubr.msk.bf16.mxu0 %vm3910_vm0, %v3909_v2  ;;  %3446 = vmatpush3.bf16.msra.mxu0 %v3615_v24  ;;  %v3646_v24 = vld [vmem:[#allocation10 + $0xf4] ss:$8 sps:$4 sm:$0xff]  }
0x10c4   :  { %3447 = vmatprep.subr.bf16.mxu0 %v3909_v2 }
0x10c7   :  { %3448 = vmatpush3.bf16.msra.mxu0 %v3616_v46  ;;  %v3644_v46 = vld [vmem:[#allocation10 + $0xf0] ss:$8 sps:$4 sm:$0xff]  }
0x10c8   :  { %3449 = vmatprep.subr.bf16.mxu0 %v3909_v2 }
0x10cb   :  { %3450 = vmatpush3.bf16.msra.mxu0 %v3617_v0 }
0x10cc   :  { %3451 = vmatprep.subr.bf16.mxu0 %v3909_v2 }
0x10cf   :  { %3452 = vmatpush3.bf16.msra.mxu0 %v3618_v3 }
0x10d0   :  { %3453 = vmatprep.subr.bf16.mxu0 %v3909_v2 }
0x10d3   :  { %3454 = vmatpush3.bf16.msra.mxu0 %v3619_v6 }
0x10d4   :  { %3455 = vmatprep.subr.bf16.mxu0 %v3909_v2 }
0x10d7   :  { %3456 = vmatpush3.bf16.msra.mxu0 %v3620_v27 }
0x10d8   :  { %3457 = vmatprep.subr.bf16.mxu0 %v3909_v2 }
0x10db   :  { %3458 = vmatpush3.bf16.msra.mxu0 %v3621_v8 }
0x10dc   :  { %3459 = vmatprep.subr.bf16.mxu0 %v3909_v2 }
0x10df   :  { %3460 = vmatpush3.bf16.msra.mxu0 %v3622_v9 }
0x1150   :  { %v2255_v11 = vpop.f32.mrb[60].mxu1 }
0x1151   :  { %v3431_v15 = vpop.f32.mrb[61].mxu1 }
0x1152   :  { %v2258_v61 = vpop.f32.mrb[62].mxu1 }
0x1153   :  { %v3432_v18 = vpop.f32.mrb[63].mxu1 }
0x1154   :  { %v3106_v18 = vld [vmem:[#allocation7 + $0x1] ss:$0 sm:$0xff] }
0x1160   :  { %v2347_v10 = vpop.f32.mrb[64].mxu1 }
0x1161   :  { %v3490_v53 = vpack.i.bf16 %v2347_v10, %v2255_v11  ;;  %v3443_v20 = vpop.f32.mrb[65].mxu1 }
0x1162   :  { %v2350_v13 = vpop.f32.mrb[66].mxu1  ;;  %v3107_v20 = vld [vmem:[#allocation8 + $0x1] ss:$0 sm:$0xff] }
0x1163   :  { %3491 = vrot.lane.b32.xlu1 %v3490_v53, %s3894_s29  ;;  %v3444_v22 = vpop.f32.mrb[67].mxu1 }
0x1185   :  { %v2209_v45 = vpop.f32.mrb[20].mxu0 }
0x1186   :  { %v3425_v23 = vpop.f32.mrb[21].mxu0 }
0x1187   :  { %v2212_v47 = vpop.f32.mrb[22].mxu0 }
0x1188   :  { %v3426_v7 = vpop.f32.mrb[23].mxu0  ;;  %v3647_v47 = vld [vmem:[#allocation11 + $0xc0] sm:$0xff]  }
0x1189   :  { %v3648_v7 = vld [vmem:[#allocation11 + $0x80] sm:$0xff]   ;;  %3247 = vmatprep.subr.bf16.mxu0 %v3647_v47 }
0x1195   :  { %v2301_v25 = vpop.f32.mrb[24].mxu0 }
0x1196   :  { %v3437_v12 = vpop.f32.mrb[25].mxu0 }
0x1197   :  { %v2304_v2 = vpop.f32.mrb[26].mxu0  ;;  %v3650_v12 = vld [vmem:[#allocation11 + $0x88] sm:$0xff]  }
0x1198   :  { %v3438_v16 = vpop.f32.mrb[27].mxu0  ;;  %v3651_v2 = vld [vmem:[#allocation11 + $0xd0] sm:$0xff]  }
0x1199   :  { %v3652_v16 = vld [vmem:[#allocation11 + $0x90] sm:$0xff]  }
0x11d5   :  { %v3492_v26 = vpop.permute.xlu1 %3491 }
0x11d6   :  { %v3494_v21 = vunpack.i.h.bf16 %v3492_v26  ;;  %v3493_v28 = vunpack.i.l.bf16 %v3492_v26  ;;  %v3653_v26 = vld [vmem:[#allocation11 + $0xd8] sm:$0xff]  }
0x11d8   :  { %v2362_v29 = vsel %vm629_vm4, %v2301_v25, %v3494_v21  ;;  %v2357_v30 = vsel %vm629_vm4, %v2209_v45, %v3493_v28  ;;  %v3649_v25 = vld [vmem:[#allocation11 + $0xc8] sm:$0xff]   ;;  %v3654_v21 = vld [vmem:[#allocation11 + $0x98] sm:$0xff]   ;;  %v3655_v28 = vld [vmem:[#allocation11 + $0xe0] sm:$0xff]  }
0x11d9   :  { %v2363_v31 = vpack.c.bf16 %v2362_v29, %v2357_v30  ;;  %v3656_v29 = vld [vmem:[#allocation11 + $0xa0] sm:$0xff]   ;;  %v3657_v30 = vld [vmem:[#allocation11 + $0xe8] sm:$0xff]  }
0x11db   :  { %3462 = vmatmul.mubr.bf16.vlgmr.msra.gmra.mrb[28].mxu0 %v2363_v31  ;;  %v3658_v31 = vld [vmem:[#allocation11 + $0xa8] sm:$0xff]  }
0x11dc   :  { %3248 = vmatpush3.bf16.msra.mxu0 %v3648_v7 }
0x11dd   :  { %3249 = vmatprep.subr.bf16.mxu0 %v3649_v25 }
0x11e0   :  { %3250 = vmatpush3.bf16.msra.mxu0 %v3650_v12 }
0x11e1   :  { %3251 = vmatprep.subr.bf16.mxu0 %v3651_v2  ;;  %v3126_v2 = vld [vmem:[%s4498_s15 + $0x1] ss:$0 sm:$0xff] }
0x11e4   :  { %3252 = vmatpush3.bf16.msra.mxu0 %v3652_v16 }
0x11e5   :  { %3253 = vmatprep.subr.bf16.mxu0 %v3653_v26 }
0x11e8   :  { %3254 = vmatpush3.bf16.msra.mxu0 %v3654_v21 }
0x11e9   :  { %3255 = vmatprep.subr.bf16.mxu0 %v3655_v28 }
0x11ec   :  { %3256 = vmatpush3.bf16.msra.mxu0 %v3656_v29 }
0x11ed   :  { %3257 = vmatprep.subr.bf16.mxu0 %v3657_v30 }
0x11f0   :  { %3258 = vmatpush3.bf16.msra.mxu0 %v3658_v31 }
0x12ae   :  { %v2471_v33 = vpop.f32.mrb[28].mxu0 }
0x12af   :  { %v2472_v34 = vadd.f32 %v3097_v32, %v2471_v33  ;;  %v3463_v35 = vpop.f32.mrb[29].mxu0  ;;  %v3660_v33 = vld [vmem:[#allocation11 + $0xb0] sm:$0xff]  }
0x12b0   :  { %v2474_v36 = vpop.f32.mrb[30].mxu0  ;;  %v3662_v35 = vld [vmem:[#allocation11 + $0xb8] sm:$0xff]  }
0x12b1   :  { %v2475_v19 = vadd.f32 %v3097_v32, %v2474_v36  ;;  %v3464_v37 = vpop.f32.mrb[31].mxu0  ;;  %v2478_v38 = vadd.f32 %v2472_v34, %v4360_v4  ;;  %v3659_v32 = vld [vmem:[#allocation11 + $0xf0] sm:$0xff]   ;;  %v3661_v34 = vld [vmem:[#allocation11 + $0xf8] sm:$0xff]  }
0x12b2   :  { %3259 = vmatprep.subr.bf16.mxu0 %v3659_v32  ;;  %v3108_v36 = vld [vmem:[%s4496_s13 + $0x2] sm:$0x3] }
0x12b3   :  { %2484 = vadd.xlane.f32.xlu0 %v2478_v38  ;;  %v2479_v39 = vadd.f32 %v2475_v19, %v4362_v5  ;;  %v3631_v5 = vld [vmem:[#allocation10 + $0xa4] ss:$8 sps:$4 sm:$0xff]   ;;  %3260 = vmatpush3.bf16.msra.mxu0 %v3660_v33  ;;  %v2546_v19 = vrot.slane %v3108_v36, %v4221_v17  ;;  %v2550_v37 = vrot.slane %v3108_v36, %v4214_v14 }
0x12b4   :  { %2637 = vmatprep.subr.bf16.mxu1 %v3631_v5  ;;  %3261 = vmatprep.subr.bf16.mxu0 %v3661_v34 }
0x12b5   :  { %2638 = vmatpush1.bf16.msra.mxu1 %v3629_v55 }
0x12b6   :  { %2639 = vmatprep.subr.bf16.mxu1 %v3634_v56 }
0x12b7   :  { %2486 = vadd.xlane.f32.xlu0 %v2479_v39  ;;  %3262 = vmatpush3.bf16.msra.mxu0 %v3662_v35 }
0x12b9   :  { %2640 = vmatpush1.bf16.msra.mxu1 %v3632_v57 }
0x12ba   :  { %2641 = vmatprep.subr.bf16.mxu1 %v3637_v58 }
0x12bd   :  { %2642 = vmatpush1.bf16.msra.mxu1 %v3635_v59 }
0x12be   :  { %2643 = vmatprep.subr.bf16.mxu1 %v3640_v60 }
0x12c1   :  { %2644 = vmatpush1.bf16.msra.mxu1 %v3638_v1 }
0x12c2   :  { %2645 = vmatprep.subr.bf16.mxu1 %v3643_v62 }
0x12c5   :  { %2646 = vmatpush1.bf16.msra.mxu1 %v3641_v63 }
0x12c6   :  { %2647 = vmatprep.subr.bf16.mxu1 %v3646_v24 }
0x12c9   :  { %2648 = vmatpush1.bf16.msra.mxu1 %v3644_v46 }
0x1340   :  { %v2485_v44 = vpop.xlane.xlu0 %2484 }
0x1341   :  { %v2488_v48 = vmul.f32 0.0078125, %v2485_v44 }
0x1343   :  { %v2490_v49 = vsub.f32 %v2478_v38, %v2488_v48 }
0x1344   :  { %v2487_v50 = vpop.xlane.xlu0 %2486 }
0x1345   :  { %v2489_v51 = vmul.f32 0.0078125, %v2487_v50  ;;  %v2492_v52 = vmul.f32 %v2490_v49, %v2490_v49 }
0x1347   :  { %v2491_v54 = vsub.f32 %v2479_v39, %v2489_v51  ;;  %2494 = vadd.xlane.f32.xlu0 %v2492_v52 }
0x1349   :  { %v2493_v4 = vmul.f32 %v2491_v54, %v2491_v54 }
0x134b   :  { %2496 = vadd.xlane.f32.xlu0 %v2493_v4 }
0x13d4   :  { %v2495_v0 = vpop.xlane.xlu0 %2494 }
0x13d5   :  { %v2498_v3 = vmul.f32 0.0078125, %v2495_v0 }
0x13d7   :  { %v2500_v6 = vadd.f32 1e-12, %v2498_v3 }
0x13d8   :  { %v2497_v27 = vpop.xlane.xlu0 %2496 }
0x13d9   :  { %3715 = vrsqrt.f32 %v2500_v6  ;;  %v2499_v8 = vmul.f32 0.0078125, %v2497_v27 }
0x13db   :  { %v2501_v11 = vadd.f32 1e-12, %v2499_v8 }
0x13dd   :  { %3717 = vrsqrt.f32 %v2501_v11 }
0x13e3   :  { %v3716_v15 = vpop.eup %3715 }
0x13e4   :  { %v2504_v61 = vmul.f32 %v3716_v15, %v2490_v49 }
0x13e6   :  { %v2512_v53 = vmul.f32 %v3106_v18, %v2504_v61 }
0x13e7   :  { %v3718_v9 = vpop.eup %3717 }
0x13e8   :  { %v2505_v10 = vmul.f32 %v3718_v9, %v2491_v54  ;;  %v4458_v22 = vadd.f32 %v3107_v20, %v2512_v53 }
0x13ea   :  { %v2513_v13 = vmul.f32 %v3106_v18, %v2505_v10 }
0x13ec   :  { %v4460_v45 = vadd.f32 %v3107_v20, %v2513_v13 }
0x13ee   :  { %v2522_v23 = vpack.c.bf16 %v4460_v45, %v4458_v22 }
0x13f0   :  { %2666 = vmatmul.mubr.bf16.vlgmr.msra.gmra.mrb[68].mxu1 %v2522_v23 }
0x14c3   :  { %v2667_v38 = vpop.f32.mrb[68].mxu1 }
0x14c4   :  { %v2668_v39 = vadd.f32 %v2667_v38, %v2546_v19  ;;  %v2669_v40 = vpop.f32.mrb[69].mxu1 }
0x14c5   :  { %v2670_v41 = vadd.f32 %v2669_v40, %v2550_v37  ;;  %v2671_v42 = vpop.f32.mrb[70].mxu1 }
0x14c6   :  { %v2680_v43 = vmul.f32 0.044715, %v2668_v39  ;;  %v2672_v44 = vadd.f32 %v2671_v42, %v2546_v19  ;;  %v2673_v48 = vpop.f32.mrb[71].mxu1  ;;  %v2676_v15 = vmul.f32 0.5, %v2668_v39 }
0x14c7   :  { %v2681_v49 = vmul.f32 0.044715, %v2670_v41  ;;  %v2674_v50 = vadd.f32 %v2673_v48, %v2550_v37  ;;  %v2677_v9 = vmul.f32 0.5, %v2670_v41 }
0x14c8   :  { %v2684_v51 = vmul.f32 %v2680_v43, %v2668_v39  ;;  %v2682_v52 = vmul.f32 0.044715, %v2672_v44  ;;  %v2678_v61 = vmul.f32 0.5, %v2672_v44 }
0x14c9   :  { %v2685_v54 = vmul.f32 %v2681_v49, %v2670_v41  ;;  %v2683_v4 = vmul.f32 0.044715, %v2674_v50  ;;  %v2679_v10 = vmul.f32 0.5, %v2674_v50  ;;  %v3144_v49 = vld [vmem:[#allocation13 + $0x1] ss:$0 sm:$0xff] }
0x14ca   :  { %v2688_v5 = vmul.f32 %v2684_v51, %v2668_v39  ;;  %v2686_v55 = vmul.f32 %v2682_v52, %v2672_v44  ;;  %v3145_v51 = vld [vmem:[%s4500_s17 + $0x1] ss:$0 sm:$0xff] }
0x14cb   :  { %v2689_v56 = vmul.f32 %v2685_v54, %v2670_v41  ;;  %v2687_v17 = vmul.f32 %v2683_v4, %v2674_v50 }
0x14cc   :  { %v2692_v57 = vadd.f32 %v2688_v5, %v2668_v39  ;;  %v2690_v14 = vmul.f32 %v2686_v55, %v2672_v44 }
0x14cd   :  { %v2691_v58 = vmul.f32 %v2687_v17, %v2674_v50  ;;  %v2693_v59 = vadd.f32 %v2689_v56, %v2670_v41 }
0x14ce   :  { %v2696_v60 = vmul.f32 0.7978846, %v2692_v57  ;;  %v2694_v1 = vadd.f32 %v2690_v14, %v2672_v44  ;;  %v3146_v57 = vld [vmem:[%s4501_s18] ss:$0 sm:$0xff] }
0x14cf   :  { %v2695_v62 = vadd.f32 %v2691_v58, %v2674_v50  ;;  %v2697_v63 = vmul.f32 0.7978846, %v2693_v59 }
0x14d0   :  { %3719 = vtanh.f32 %v2696_v60  ;;  %v2698_v24 = vmul.f32 0.7978846, %v2694_v1  ;;  %v3147_v60 = vld [vmem:[#allocation2] ss:$0 sm:$0xff] }
0x14d1   :  { %v2699_v46 = vmul.f32 0.7978846, %v2695_v62  ;;  %3721 = vtanh.f32 %v2697_v63 }
0x14d2   :  { %3723 = vtanh.f32 %v2698_v24 }
0x14d3   :  { %3725 = vtanh.f32 %v2699_v46 }
0x14da   :  { %v3720_v0 = vpop.eup %3719 }
0x14db   :  { %v3722_v3 = vpop.eup %3721  ;;  %v2704_v6 = vadd.f32 1.0, %v3720_v0 }
0x14dc   :  { %v3724_v27 = vpop.eup %3723  ;;  %v2705_v8 = vadd.f32 1.0, %v3722_v3 }
0x14dd   :  { %v3726_v11 = vpop.eup %3725  ;;  %v2706_v18 = vadd.f32 1.0, %v3724_v27  ;;  %v2708_v20 = vmul.f32 %v2704_v6, %v2676_v15 }
0x14de   :  { %v2707_v53 = vadd.f32 1.0, %v3726_v11  ;;  %v2709_v23 = vmul.f32 %v2705_v8, %v2677_v9 }
0x14df   :  { %v2710_v13 = vmul.f32 %v2706_v18, %v2678_v61 }
0x14e0   :  { %v2711_v47 = vmul.f32 %v2707_v53, %v2679_v10 }
0x14e1   :  { %v2712_v7 = vpack.c.bf16 %v2710_v13, %v2708_v20 }
0x14e2   :  { %v2713_v25 = vpack.c.bf16 %v2711_v47, %v2709_v23 }
0x14e4   :  { %2883 = vmatprep.mubr.bf16.mxu0 %v2713_v25 }
0x14e5   :  { %2884 = vmatmul.mubr.bf16.vlgmr.msra.gmra.mrb[32].mxu0 %v2712_v7 }
0x15b8   :  { %v3263_v12 = vpop.f32.mrb[32].mxu0 }
0x15b9   :  { %v3264_v16 = vpop.f32.mrb[33].mxu0 }
0x15ba   :  { %v3265_v26 = vadd.f32 %v3264_v16, %v3263_v12  ;;  %v3266_v21 = vpop.f32.mrb[34].mxu0 }
0x15bb   :  { %v3267_v28 = vpop.f32.mrb[35].mxu0 }
0x15bc   :  { %v2886_v29 = vadd.f32 %v3265_v26, %v3126_v2  ;;  %v3268_v30 = vadd.f32 %v3267_v28, %v3266_v21 }
0x15be   :  { %v2889_v31 = vadd.f32 %v3268_v30, %v3126_v2  ;;  %v2892_v32 = vadd.f32 %v2886_v29, %v4458_v22 }
0x15c0   :  { %2898 = vadd.xlane.f32.xlu0 %v2892_v32  ;;  %v2893_v33 = vadd.f32 %v2889_v31, %v4460_v45 }
0x15c2   :  { %2900 = vadd.xlane.f32.xlu1 %v2893_v33 }
0x164d   :  { %v2899_v34 = vpop.xlane.xlu0 %2898 }
0x164e   :  { %v2902_v36 = vmul.f32 0.0078125, %v2899_v34 }
0x164f   :  { %v2901_v35 = vpop.xlane.xlu1 %2900 }
0x1650   :  { %v2903_v19 = vmul.f32 0.0078125, %v2901_v35  ;;  %v2904_v38 = vsub.f32 %v2892_v32, %v2902_v36 }
0x1652   :  { %v2905_v37 = vsub.f32 %v2893_v33, %v2903_v19  ;;  %v2906_v40 = vmul.f32 %v2904_v38, %v2904_v38 }
0x1654   :  { %v2907_v39 = vmul.f32 %v2905_v37, %v2905_v37 }
0x1656   :  { %2910 = vadd.xlane.f32.xlu0 %v2907_v39 }
0x165a   :  { %2908 = vadd.xlane.f32.xlu0 %v2906_v40 }
0x16e3   :  { %v2911_v41 = vpop.xlane.xlu0 %2910 }
0x16e4   :  { %v2913_v42 = vmul.f32 0.0078125, %v2911_v41 }
0x16e6   :  { %v2915_v43 = vadd.f32 1e-12, %v2913_v42 }
0x16e7   :  { %v2909_v44 = vpop.xlane.xlu0 %2908 }
0x16e8   :  { %3727 = vrsqrt.f32 %v2915_v43  ;;  %v2912_v22 = vmul.f32 0.0078125, %v2909_v44 }
0x16ea   :  { %v2914_v48 = vadd.f32 1e-12, %v2912_v22 }
0x16ec   :  { %3729 = vrsqrt.f32 %v2914_v48 }
0x16f2   :  { %v3728_v45 = vpop.eup %3727 }
0x16f3   :  { %v2919_v50 = vmul.f32 %v3728_v45, %v2905_v37 }
0x16f5   :  { %v2927_v52 = vmul.f32 %v3144_v49, %v2919_v50 }
0x16f6   :  { %v3730_v54 = vpop.eup %3729 }
0x16f7   :  { %v2918_v4 = vmul.f32 %v3730_v54, %v2904_v38  ;;  %v2935_v5 = vadd.f32 %v3145_v51, %v2927_v52 }
0x16f9   :  { %v2926_v55 = vmul.f32 %v3144_v49, %v2918_v4  ;;  %v2937_v17 = vrot.slane %v2935_v5, 7 }
0x16fb   :  { %v2934_v56 = vadd.f32 %v3145_v51, %v2926_v55 }
0x16fd   :  { %v2940_v14 = vsel %vm2939_vm7, %v2934_v56, %v2937_v17 }
0x16fe   :  { %v2948_v58 = vmul.f32 %v3146_v57, %v2940_v14 }
0x1700   :  { %v2950_v59 = vsel %vm2949_vm8, %v2948_v58, 0.0 }
0x1701   :  { %2951 = vadd.xlane.f32.xlu0 %v2950_v59 }
0x178e   :  { %v2952_v1 = vpop.xlane.xlu0 %2951 }
0x178f   :  { %v2960_v62 = vadd.f32 %v3147_v60, %v2952_v1 }
0x1791   :  { %2962 = vst.msk [vmem:[%s4503_s20] sm:$0x3] %vm2961_vm9, %v2960_v62 }
0x1792   :  { %2967 = vsyncpa [#allocation4], 1 }
0x1793   :  { %2968 = vsyncpa [#allocation6], 1 }
0x1794   :  { %2969 = vsyncpa [#allocation9], 1 }
0x1795   :  { %2970 = vsyncpa [#allocation12], 1 }

</bundles_post_ra>
